<compile_context>
chip_gen: v7x
topology: tpu7x:2x2x1
jax: 0.10.0
libtpu: 0.0.40
codegen_flags: <defaults>
</compile_context>

<pallas_src>
import functools

import jax
import jax.numpy as jnp
from jax.experimental import pallas as pl
from jax.experimental.pallas import tpu as pltpu


def linear_kernel(x_ref, w_ref, b_ref, o_ref):
    # x_ref: (tm, K) f32    w_ref: (K, N) bf16 (VMEM-resident)
    # b_ref: (1, N)  f32    o_ref: (tm, N)
    x_bf16 = x_ref[...].astype(jnp.bfloat16)          # in-kernel cast, hidden under DMA
    acc = jnp.dot(x_bf16, w_ref[...], preferred_element_type=jnp.float32)
    o_ref[...] = (acc + b_ref[...]).astype(o_ref.dtype)
    # Dropout(p=0.1) is identity at inference time.
    # TODO(synk): training-mode inverted dropout (pltpu.prng_seed / prng_random_bits) not emitted.


@functools.partial(jax.jit, static_argnames=("tm", "out_dtype"))
def flatten_linear_dropout(x, w_bf16, bias_f32, *, tm=192, out_dtype=None):
    """x: (B, S, H, D) with H*D == in_features (f32).
    w_bf16: (in, out) pre-cast bf16 weight.  bias_f32: (1, out) f32.
    Returns (B, S, out)."""
    B, S, H, D = x.shape
    K = H * D
    N = w_bf16.shape[1]
    M = B * S
    if out_dtype is None:
        out_dtype = x.dtype

    # flatten(2): contiguous reshape, no data movement.
    x2d = x.reshape(M, K)

    # Pick a tile that divides M exactly (no padding, no post-slice). Prefer the
    # largest sublane-aligned (multiple-of-8) divisor <= requested tm; otherwise
    # fall back to a single full-M block (always layout-legal).
    if M % tm != 0:
        tm_aligned = max((tm // 8) * 8, 8)
        tm = next((t for t in range(tm_aligned, 0, -8) if M % t == 0), M)
    grid_m = M // tm

    cost = pl.CostEstimate(
        flops=2 * M * K * N,
        transcendentals=0,
        bytes_accessed=(x2d.size * x2d.dtype.itemsize
                        + w_bf16.size * w_bf16.dtype.itemsize
                        + bias_f32.size * bias_f32.dtype.itemsize
                        + M * N * jnp.dtype(out_dtype).itemsize),
    )

    out = pl.pallas_call(
        linear_kernel,
        out_shape=jax.ShapeDtypeStruct((M, N), out_dtype),
        grid_spec=pltpu.PrefetchScalarGridSpec(
            num_scalar_prefetch=0,
            grid=(grid_m,),
            in_specs=[
                pl.BlockSpec((tm, K), lambda i: (i, 0)),   # activation tile: double-buffered
                pl.BlockSpec((K, N), lambda i: (0, 0)),    # weight: constant index map -> VMEM-resident
                pl.BlockSpec((1, N), lambda i: (0, 0)),    # bias: VMEM-resident
            ],
            out_specs=pl.BlockSpec((tm, N), lambda i: (i, 0)),  # lane-dense (N = 768 = 6*128)
        ),
        compiler_params=pltpu.CompilerParams(
            # Each M-tile is independent (K fully resident, no carried accumulator):
            # parallel semantics allows dual-TensorCore sharding on v7x / megacore.
            dimension_semantics=("parallel",),
        ),
        cost_estimate=cost,
    )(x2d, w_bf16, bias_f32)

    return out.reshape(B, S, N)


if __name__ == "__main__":
    key = jax.random.PRNGKey(0)
    k_x, k_w, k_b = jax.random.split(key, 3)

    # Shapes implied by the module: x [1, 384, 12, 64] -> flatten(2) -> [1, 384, 768]
    B, S, H, D = 1, 384, 12, 64
    in_features = H * D          # 768
    out_features = 768

    x = jax.random.normal(k_x, (B, S, H, D), dtype=jnp.float32)

    # Deterministic nn.Linear-style init: U(-1/sqrt(in), 1/sqrt(in)).
    bound = 1.0 / jnp.sqrt(jnp.float32(in_features))
    # PyTorch weight is (out, in); store transposed (in, out) for direct matmul.
    w_out_in = jax.random.uniform(k_w, (out_features, in_features),
                                  minval=-bound, maxval=bound, dtype=jnp.float32)
    w_in_out = jnp.transpose(w_out_in)
    bias = jax.random.uniform(k_b, (out_features,),
                              minval=-bound, maxval=bound, dtype=jnp.float32)

    # One-time (init-time) parameter prep, hoisted out of the per-call path.
    w_bf16 = jnp.asarray(w_in_out, dtype=jnp.bfloat16)
    bias2d = bias.reshape(1, out_features).astype(jnp.float32)
    jax.block_until_ready((w_bf16, bias2d))

    y = flatten_linear_dropout(x, w_bf16, bias2d)
    jax.block_until_ready(y)

    # Reference with the same bf16-quantized operands and f32 accumulation.
    x_bf = x.reshape(B, S, in_features).astype(jnp.bfloat16).astype(jnp.float32)
    w_bf = w_bf16.astype(jnp.float32)
    y_ref = jnp.einsum("bsk,kn->bsn", x_bf, w_bf,
                       precision=jax.lax.Precision.HIGHEST) + bias

    assert y.shape == (B, S, out_features)
    assert y.dtype == x.dtype
    max_err = float(jnp.max(jnp.abs(y.astype(jnp.float32) - y_ref)))
    assert jnp.allclose(y.astype(jnp.float32), y_ref, atol=2e-2, rtol=2e-2), max_err

    print("KERNEL_OK")
</pallas_src>

<mosaic_0001>
module attributes {stable_mosaic.version = 11 : i64} {
  func.func @linear_kernel(%arg0: i32, %arg1: memref<192x768xf32, #tpu.memory_space<vmem>>, %arg2: memref<768x768xbf16, #tpu.memory_space<vmem>>, %arg3: memref<1x768xf32, #tpu.memory_space<vmem>>, %arg4: memref<192x768xf32, #tpu.memory_space<vmem>>) attributes {dimension_semantics = [#tpu.dimension_semantics<parallel>], iteration_bounds = array<i64: 2>, scalar_prefetch = 0 : i64, scratch_operands = 0 : i64, tpu.core_type = #tpu.core_type<tc>, window_params = [{transform_indices = @transform_0, window_bounds = array<i64: 192, 768>}, {pipeline_mode = #tpu.pipeline_mode<synchronous>, transform_indices = @transform_1, window_bounds = array<i64: 768, 768>}, {pipeline_mode = #tpu.pipeline_mode<synchronous>, transform_indices = @transform_2, window_bounds = array<i64: 1, 768>}, {transform_indices = @transform_3, window_bounds = array<i64: 192, 768>}]} {
    %c0 = arith.constant 0 : index
    %c0_0 = arith.constant 0 : index
    %0 = vector.load %arg1[%c0, %c0_0] : memref<192x768xf32, #tpu.memory_space<vmem>>, vector<192x768xf32>
    %1 = arith.truncf %0 : vector<192x768xf32> to vector<192x768xbf16>
    %c0_1 = arith.constant 0 : index
    %c0_2 = arith.constant 0 : index
    %2 = vector.load %arg2[%c0_1, %c0_2] : memref<768x768xbf16, #tpu.memory_space<vmem>>, vector<768x768xbf16>
    %cst = arith.constant dense<0.000000e+00> : vector<192x768xf32>
    %3 = tpu.matmul %1, %2, %cst {dimension_numbers = #tpu.dot_dimension_numbers<[1], [0], [0], [1], [0, 0, 1, 1], [], []>} : vector<192x768xbf16>, vector<768x768xbf16>, vector<192x768xf32> -> vector<192x768xf32>
    %c0_3 = arith.constant 0 : index
    %c0_4 = arith.constant 0 : index
    %4 = vector.load %arg3[%c0_3, %c0_4] : memref<1x768xf32, #tpu.memory_space<vmem>>, vector<1x768xf32>
    %5 = vector.broadcast %4 : vector<1x768xf32> to vector<192x768xf32>
    %6 = arith.addf %3, %5 : vector<192x768xf32>
    %c0_5 = arith.constant 0 : index
    %c0_6 = arith.constant 0 : index
    %7 = vector.load %arg4[%c0_5, %c0_6] : memref<192x768xf32, #tpu.memory_space<vmem>>, vector<192x768xf32>
    tpu.vector_store %arg4[%c0_5, %c0_6], %6 {strides = array<i32>} : memref<192x768xf32, #tpu.memory_space<vmem>>, vector<192x768xf32>,
    return
  }
  func.func @transform_0(%arg0: i32) -> (i32, i32) {
    %c0_i32 = arith.constant 0 : i32
    %c0_i32_0 = arith.constant 0 : i32
    return %arg0, %c0_i32 : i32, i32
  }
  func.func @transform_1(%arg0: i32) -> (i32, i32) {
    %c0_i32 = arith.constant 0 : i32
    %c0_i32_0 = arith.constant 0 : i32
    %c0_i32_1 = arith.constant 0 : i32
    return %c0_i32, %c0_i32_0 : i32, i32
  }
  func.func @transform_2(%arg0: i32) -> (i32, i32) {
    %c0_i32 = arith.constant 0 : i32
    %c0_i32_0 = arith.constant 0 : i32
    %c0_i32_1 = arith.constant 0 : i32
    return %c0_i32, %c0_i32_0 : i32, i32
  }
  func.func @transform_3(%arg0: i32) -> (i32, i32) {
    %c0_i32 = arith.constant 0 : i32
    %c0_i32_0 = arith.constant 0 : i32
    return %arg0, %c0_i32 : i32, i32
  }
}

</mosaic_0001>

<bundles_post_ra>
// kernel: flatten_linear_dropout.1
= control target key start
LH: loop header
LB: loop body
LE: loop exit
PB: predicated region body
PF: predicated region fallthrough
CT: control target
= control target key end

     0   :  { %8 = vsyncpa [#allocation3], 0  ;;  %s7087_s0 = inlined_call_operand.vmem [shape: f32[384,768], index: 0, kind: input, shape index: {}]   ;;  %s7088_s1 = inlined_call_operand.vmem [shape: bf16[768,768], index: 1, kind: input, shape index: {}]   ;;  %s7089_s2 = inlined_call_operand.vmem [shape: f32[1,768], index: 2, kind: input, shape index: {}]   ;;  %s7090_s3 = inlined_call_operand.hbm [shape: f32[384,768], index: 3, kind: output, shape index: {}]  }
   0x1   :  { %10 = vsyncpa [#allocation3 + $0x1], 0  ;;  %s5073_s12 = smov 0   ;;  %s5075_s13 = smov 0  }
   0x2   :  { %s5077_s14 = smov 0   ;;  %s5079_s15 = smov 0  }
   0x3 LB: > { %s5094_s16 = sadd.s32 4294967295, %s5048_s15   ;;  %s3749_s17 = sadd.s32 4294967294, %s5048_s15   ;;  %s5048_s15 = sphi %s5079_s15, %s7234_s15   ;;  %s5044_s14 = sphi %s5077_s14, %s7233_s14   ;;  %s5040_s13 = sphi %s5075_s13, %s7232_s13   ;;  %s5036_s12 = sphi %s5073_s12, %s7231_s12  }
   0x4   : > { %s5098_s18 = sadd.s32 1, %s5048_s15   ;;  %s91_s19 = sadd.s32 1, %s5044_s14 }
   0x5   : > { %s88_s20 = ssub.s32 %s5048_s15, %s5098_s18  ;;  %p101_p0 = scmp.ne.s32.totalorder %s5044_s14, %s5040_s13 }
   0x6   : > { %p89_p1 = scmp.eq.s32.totalorder %s88_s20, 0  ;;  %p102_p2 = scmp.eq.s32.totalorder %s5094_s16, 1 }
   0x7   : > { %p107_p3 = scmp.ne.s32.totalorder %s5040_s13, %s5036_s12  ;;  %p108_p4 = scmp.eq.s32.totalorder %s3749_s17, 1 }
   0x8   : > { %s5109_s21 = scalar_select %p89_p1, %s5044_s14, %s91_s19  }
   0x9   : > { %p5111_p5 = por %p102_p2, %p101_p0  ;;  %p5115_p6 = por %p108_p4, %p107_p3 }
   0xa   : > { %p3752_p7 = scmp.ge.s32.totalorder %s5048_s15, 1  ;;  %p142_p8 = scmp.lt.s32.totalorder %s5048_s15, 3 }
   0xc   : > { %p143_p9 = pnand %p3752_p7, %p142_p8 }
   0xe   : > { %146 = sbr.rel (%p143_p9) target bundleno = 743 (0x2e7), region = 32 }
  0x15   : > { %v4554_v0 = vld [vmem:[%s7088_s1 + $0x4] ss:$24 sps:$4 sm:$0xff]   ;;  %v4558_v2 = vld [vmem:[%s7088_s1] ss:$24 sps:$4 sm:$0xff]   ;;  %v4560_v4 = vld [vmem:[%s7088_s1 + $0x34] ss:$24 sps:$4 sm:$0xff]  }
  0x16   : > { %v4556_v1 = vld [vmem:[%s7088_s1 + $0x304] ss:$24 sps:$4 sm:$0xff]   ;;  %2151 = vmatprep.subr.bf16.mxu1 %v4554_v0  ;;  %v4559_v3 = vld [vmem:[%s7088_s1 + $0x300] ss:$24 sps:$4 sm:$0xff]   ;;  %v4562_v5 = vld [vmem:[%s7088_s1 + $0x334] ss:$24 sps:$4 sm:$0xff]  }
  0x17   : > { %2304 = vmatprep.subr.bf16.mxu0 %v4556_v1  ;;  %2152 = vmatpush1.bf16.msra.mxu1 %v4558_v2  ;;  %v4564_v6 = vld [vmem:[%s7088_s1 + $0x30] ss:$24 sps:$4 sm:$0xff]   ;;  %v4566_v8 = vld [vmem:[%s7088_s1 + $0x64] ss:$24 sps:$4 sm:$0xff]   ;;  %v4570_v10 = vld [vmem:[%s7088_s1 + $0x60] ss:$24 sps:$4 sm:$0xff]  }
  0x18   : > { %2305 = vmatpush1.bf16.msra.mxu0 %v4559_v3  ;;  %2153 = vmatprep.subr.bf16.mxu1 %v4560_v4  ;;  %v4565_v7 = vld [vmem:[%s7088_s1 + $0x330] ss:$24 sps:$4 sm:$0xff]   ;;  %v4568_v9 = vld [vmem:[%s7088_s1 + $0x364] ss:$24 sps:$4 sm:$0xff]   ;;  %v4571_v11 = vld [vmem:[%s7088_s1 + $0x360] ss:$24 sps:$4 sm:$0xff]  }
  0x19   : > { %2306 = vmatprep.subr.bf16.mxu0 %v4562_v5  ;;  %v4572_v12 = vld [vmem:[%s7088_s1 + $0x94] ss:$24 sps:$4 sm:$0xff]   ;;  %v4576_v14 = vld [vmem:[%s7088_s1 + $0x90] ss:$24 sps:$4 sm:$0xff]   ;;  %v4578_v16 = vld [vmem:[%s7088_s1 + $0xc4] ss:$24 sps:$4 sm:$0xff]  }
  0x1a   : > { %v4574_v13 = vld [vmem:[%s7088_s1 + $0x394] ss:$24 sps:$4 sm:$0xff]   ;;  %v4577_v15 = vld [vmem:[%s7088_s1 + $0x390] ss:$24 sps:$4 sm:$0xff]   ;;  %v4580_v17 = vld [vmem:[%s7088_s1 + $0x3c4] ss:$24 sps:$4 sm:$0xff]  }
  0x1b   : > { %2154 = vmatpush1.bf16.msra.mxu1 %v4564_v6  ;;  %v4582_v18 = vld [vmem:[%s7088_s1 + $0xc0] ss:$24 sps:$4 sm:$0xff]   ;;  %v4584_v20 = vld [vmem:[%s7088_s1 + $0xf4] ss:$24 sps:$4 sm:$0xff]   ;;  %v4588_v22 = vld [vmem:[%s7088_s1 + $0xf0] ss:$24 sps:$4 sm:$0xff]  }
  0x1c   : > { %2307 = vmatpush1.bf16.msra.mxu0 %v4565_v7  ;;  %2155 = vmatprep.subr.bf16.mxu1 %v4566_v8  ;;  %v4583_v19 = vld [vmem:[%s7088_s1 + $0x3c0] ss:$24 sps:$4 sm:$0xff]   ;;  %v4586_v21 = vld [vmem:[%s7088_s1 + $0x3f4] ss:$24 sps:$4 sm:$0xff]   ;;  %v4589_v23 = vld [vmem:[%s7088_s1 + $0x3f0] ss:$24 sps:$4 sm:$0xff]  }
  0x1d   : > { %2308 = vmatprep.subr.bf16.mxu0 %v4568_v9  ;;  %v4590_v24 = vld [vmem:[%s7088_s1 + $0x124] ss:$24 sps:$4 sm:$0xff]   ;;  %v4594_v26 = vld [vmem:[%s7088_s1 + $0x120] ss:$24 sps:$4 sm:$0xff]   ;;  %s167_s26 = smul.u32 24, %s5094_s16  ;;  %s164_s17 = sand.u32 1, %s5040_s13  }
  0x1e   : > { %v4592_v25 = vld [vmem:[%s7088_s1 + $0x424] ss:$24 sps:$4 sm:$0xff]   ;;  %v4595_v27 = vld [vmem:[%s7088_s1 + $0x420] ss:$24 sps:$4 sm:$0xff]   ;;  %v4596_v28 = vld [vmem:[%s7088_s1 + $0x154] ss:$24 sps:$4 sm:$0xff]  }
  0x1f   : > { %2156 = vmatpush1.bf16.msra.mxu1 %v4570_v10  ;;  %v4598_v29 = vld [vmem:[%s7088_s1 + $0x454] ss:$24 sps:$4 sm:$0xff]   ;;  %v4600_v30 = vld [vmem:[%s7088_s1 + $0x150] ss:$24 sps:$4 sm:$0xff]   ;;  %p168_p10 = scmp.lt.s32.totalorder %s167_s26, 47  ;;  %s4509_s20 = smul.u32 1152, %s164_s17 }
  0x20   : > { %2309 = vmatpush1.bf16.msra.mxu0 %v4571_v11  ;;  %2157 = vmatprep.subr.bf16.mxu1 %v4572_v12  ;;  %v4601_v31 = vld [vmem:[%s7088_s1 + $0x450] ss:$24 sps:$4 sm:$0xff]   ;;  %v4602_v32 = vld [vmem:[%s7088_s1 + $0x184] ss:$24 sps:$4 sm:$0xff]   ;;  %v4606_v34 = vld [vmem:[%s7088_s1 + $0x180] ss:$24 sps:$4 sm:$0xff]  }
  0x21   : > { %2310 = vmatprep.subr.bf16.mxu0 %v4574_v13  ;;  %v4604_v33 = vld [vmem:[%s7088_s1 + $0x484] ss:$24 sps:$4 sm:$0xff]   ;;  %v4607_v35 = vld [vmem:[%s7088_s1 + $0x480] ss:$24 sps:$4 sm:$0xff]   ;;  %s7236_s26 = smov (!%p168_p10, %s167_s26), 47  ;;  %s6502_s4 = scalar_lea.vmem [#allocation2], %s4509_s20 }
  0x22   : > { %v4608_v36 = vld [vmem:[%s7088_s1 + $0x1b4] ss:$24 sps:$4 sm:$0xff]   ;;  %v4612_v38 = vld [vmem:[%s7088_s1 + $0x1b0] ss:$24 sps:$4 sm:$0xff]   ;;  %s4510_s5 = smul.u32 48, %s7236_s26  ;;  %s3687_s19 = sshll.u32 %s6502_s4, 4  ;;  %s7035_s19 = int_to_ptr.vmem [resolvable:$true] %s3687_s19 }
  0x23   : > { %2158 = vmatpush1.bf16.msra.mxu1 %v4576_v14  ;;  %v4610_v37 = vld [vmem:[%s7088_s1 + $0x4b4] ss:$24 sps:$4 sm:$0xff]   ;;  %v4613_v39 = vld [vmem:[%s7088_s1 + $0x4b0] ss:$24 sps:$4 sm:$0xff]   ;;  %v4614_v40 = vld [vmem:[%s7088_s1 + $0x1e4] ss:$24 sps:$4 sm:$0xff]  }
  0x24   : > { %2311 = vmatpush1.bf16.msra.mxu0 %v4577_v15  ;;  %2159 = vmatprep.subr.bf16.mxu1 %v4578_v16  ;;  %v4616_v41 = vld [vmem:[%s7088_s1 + $0x4e4] ss:$24 sps:$4 sm:$0xff]   ;;  %v4618_v42 = vld [vmem:[%s7088_s1 + $0x1e0] ss:$24 sps:$4 sm:$0xff]   ;;  %s5257_s27 = scalar_lea.vmem %s7087_s0, %s4510_s5  ;;  %v4620_v44 = vld [vmem:[%s7088_s1 + $0x214] ss:$24 sps:$4 sm:$0xff]  }
  0x25   : > { %2312 = vmatprep.subr.bf16.mxu0 %v4580_v17  ;;  %v4619_v43 = vld [vmem:[%s7088_s1 + $0x4e0] ss:$24 sps:$4 sm:$0xff]   ;;  %v4622_v45 = vld [vmem:[%s7088_s1 + $0x514] ss:$24 sps:$4 sm:$0xff]   ;;  %v4624_v50 = vld [vmem:[%s7088_s1 + $0x210] ss:$24 sps:$4 sm:$0xff]  }
  0x26   : > { %v176_v46 = vld [vmem:[%s5257_s27 + $0x8] sm:$0xff]  ;;  %v182_v47 = vld [vmem:[%s5257_s27 + $0x38] sm:$0xff]  ;;  %v175_v6 = vld [vmem:[%s5257_s27] sm:$0xff]  ;;  %s4518_s11 = smul.u32 18432, %s5094_s16  ;;  %s7046_s24 = scalar_lea.sflag [#allocation3], %s164_s17 }
  0x27   : > { %2160 = vmatpush1.bf16.msra.mxu1 %v4582_v18  ;;  %v178_v48 = vld [vmem:[%s5257_s27 + $0x18] sm:$0xff]  ;;  %v184_v49 = vld [vmem:[%s5257_s27 + $0x48] sm:$0xff]  ;;  %v5278_v53 = vpack.c.bf16 %v182_v47, %v176_v46  ;;  %v181_v7 = vld [vmem:[%s5257_s27 + $0x30] sm:$0xff]  ;;  %s5050_s25 = smov [#allocation2]  }
  0x28   : > { %2313 = vmatpush1.bf16.msra.mxu0 %v4583_v19  ;;  %2161 = vmatprep.subr.bf16.mxu1 %v4584_v20  ;;  %v4625_v51 = vld [vmem:[%s7088_s1 + $0x510] ss:$24 sps:$4 sm:$0xff]   ;;  %v4626_v52 = vld [vmem:[%s7088_s1 + $0x244] ss:$24 sps:$4 sm:$0xff]   ;;  %v5280_v54 = vpack.c.bf16 %v184_v49, %v178_v48  ;;  %v4630_v56 = vld [vmem:[%s7088_s1 + $0x240] ss:$24 sps:$4 sm:$0xff]   ;;  %v5346_v15 = vpack.c.bf16 %v181_v7, %v175_v6  ;;  %s7033_s20 = scalar_lea.hbm %s7090_s3, %s4518_s11 }
  0x29   : > { %2314 = vmatprep.subr.bf16.mxu0 %v4586_v21  ;;  %v4628_v55 = vld [vmem:[%s7088_s1 + $0x544] ss:$24 sps:$4 sm:$0xff]   ;;  %2183 = vmatprep.mubr.bf16.mxu1 %v5278_v53  ;;  %v4631_v57 = vld [vmem:[%s7088_s1 + $0x540] ss:$24 sps:$4 sm:$0xff]   ;;  %v4632_v58 = vld [vmem:[%s7088_s1 + $0x274] ss:$24 sps:$4 sm:$0xff]  }
  0x2a   : > { %2336 = vmatprep.mubr.bf16.mxu0 %v5280_v54  ;;  %v4634_v59 = vld [vmem:[%s7088_s1 + $0x574] ss:$24 sps:$4 sm:$0xff]   ;;  %v4636_v60 = vld [vmem:[%s7088_s1 + $0x270] ss:$24 sps:$4 sm:$0xff]   ;;  %v4638_v62 = vld [vmem:[%s7088_s1 + $0x2a4] ss:$24 sps:$4 sm:$0xff]  }
  0x2b   : > { %2162 = vmatpush1.bf16.msra.mxu1 %v4588_v22  ;;  %v4637_v61 = vld [vmem:[%s7088_s1 + $0x570] ss:$24 sps:$4 sm:$0xff]   ;;  %v4640_v63 = vld [vmem:[%s7088_s1 + $0x5a4] ss:$24 sps:$4 sm:$0xff]   ;;  %v4642_v0 = vld [vmem:[%s7088_s1 + $0x2a0] ss:$24 sps:$4 sm:$0xff]  }
  0x2c   : > { %2315 = vmatpush1.bf16.msra.mxu0 %v4589_v23  ;;  %2163 = vmatprep.subr.bf16.mxu1 %v4590_v24  ;;  %v4643_v1 = vld [vmem:[%s7088_s1 + $0x5a0] ss:$24 sps:$4 sm:$0xff]   ;;  %v4644_v2 = vld [vmem:[%s7088_s1 + $0x2d4] ss:$24 sps:$4 sm:$0xff]   ;;  %v4648_v4 = vld [vmem:[%s7088_s1 + $0x2d0] ss:$24 sps:$4 sm:$0xff]  }
  0x2d   : > { %2316 = vmatprep.subr.bf16.mxu0 %v4592_v25  ;;  %v4646_v3 = vld [vmem:[%s7088_s1 + $0x5d4] ss:$24 sps:$4 sm:$0xff]   ;;  %v4649_v5 = vld [vmem:[%s7088_s1 + $0x5d0] ss:$24 sps:$4 sm:$0xff]   ;;  %v183_v9 = vld [vmem:[%s5257_s27 + $0x40] sm:$0xff]  ;;  %s4990_s28 = sshll.u32 %s5050_s25, 4  ;;  %s4991_s28 = int_to_ptr.vmem [resolvable:$false] %s4990_s28 }
  0x2e   : > { %v177_v8 = vld [vmem:[%s5257_s27 + $0x10] sm:$0xff]  ;;  %v4652_v10 = vld [vmem:[%s7088_s1 + $0x604] ss:$24 sps:$4 sm:$0xff]   ;;  %v4650_v12 = vld [vmem:[%s7088_s1 + $0x600] ss:$24 sps:$4 sm:$0xff]   ;;  %s4992_s29 = scalar_lea.vmem %s4991_s28, 36864  ;;  %p4993_p0 = scmp.lt.s32.totalorder %s7035_s19, %s4991_s28 }
  0x2f   : > { %2164 = vmatpush1.bf16.msra.mxu1 %v4594_v26  ;;  %v4655_v11 = vld [vmem:[%s7088_s1 + $0xc] ss:$24 sps:$4 sm:$0xff]   ;;  %v4653_v13 = vld [vmem:[%s7088_s1 + $0x8] ss:$24 sps:$4 sm:$0xff]   ;;  %v5348_v16 = vpack.c.bf16 %v183_v9, %v177_v8  ;;  %v194_v17 = vld [vmem:[%s5257_s27 + $0x98] sm:$0xff] }
  0x30   : > { %2317 = vmatpush1.bf16.msra.mxu0 %v4595_v27  ;;  %2165 = vmatprep.subr.bf16.mxu1 %v4596_v28  ;;  %v188_v14 = vld [vmem:[%s5257_s27 + $0x68] sm:$0xff]  ;;  %v190_v18 = vld [vmem:[%s5257_s27 + $0x78] sm:$0xff]  ;;  %v187_v26 = vld [vmem:[%s5257_s27 + $0x60] sm:$0xff] }
  0x31   : > { %2318 = vmatprep.subr.bf16.mxu0 %v4598_v29  ;;  %v196_v19 = vld [vmem:[%s5257_s27 + $0xa8] sm:$0xff]  ;;  %v4661_v21 = vld [vmem:[%s7088_s1 + $0x3c] ss:$24 sps:$4 sm:$0xff]   ;;  %v4659_v23 = vld [vmem:[%s7088_s1 + $0x38] ss:$24 sps:$4 sm:$0xff]   ;;  %v5365_v24 = vpack.c.bf16 %v194_v17, %v188_v14 }
  0x32   : > { %v4658_v20 = vld [vmem:[%s7088_s1 + $0x634] ss:$24 sps:$4 sm:$0xff]   ;;  %v4656_v22 = vld [vmem:[%s7088_s1 + $0x630] ss:$24 sps:$4 sm:$0xff]   ;;  %v5367_v25 = vpack.c.bf16 %v196_v19, %v190_v18  ;;  %v195_v29 = vld [vmem:[%s5257_s27 + $0xa0] sm:$0xff] }
  0x33   : > { %2166 = vmatpush1.bf16.msra.mxu1 %v4600_v30  ;;  %v193_v27 = vld [vmem:[%s5257_s27 + $0x90] sm:$0xff]  ;;  %v4664_v30 = vld [vmem:[%s7088_s1 + $0x664] ss:$24 sps:$4 sm:$0xff]   ;;  %v224_v8 = vld [vmem:[%s5257_s27 + $0x188] sm:$0xff] }
  0x34   : > { %2319 = vmatpush1.bf16.msra.mxu0 %v4601_v31  ;;  %2167 = vmatprep.subr.bf16.mxu1 %v4602_v32  ;;  %v189_v28 = vld [vmem:[%s5257_s27 + $0x70] sm:$0xff]  ;;  %v4667_v31 = vld [vmem:[%s7088_s1 + $0x6c] ss:$24 sps:$4 sm:$0xff]   ;;  %v230_v9 = vld [vmem:[%s5257_s27 + $0x1b8] sm:$0xff] }
  0x35   : > { %2320 = vmatprep.subr.bf16.mxu0 %v4604_v33  ;;  %v200_v32 = vld [vmem:[%s5257_s27 + $0xc8] sm:$0xff]  ;;  %v206_v33 = vld [vmem:[%s5257_s27 + $0xf8] sm:$0xff]  ;;  %v5479_v18 = vpack.c.bf16 %v230_v9, %v224_v8 }
  0x36   : > { %v4668_v46 = vld [vmem:[%s7088_s1 + $0x690] ss:$24 sps:$4 sm:$0xff]   ;;  %v4670_v47 = vld [vmem:[%s7088_s1 + $0x694] ss:$24 sps:$4 sm:$0xff]   ;;  %v4710_v8 = vld [vmem:[%s7088_s1 + $0x7e0] ss:$24 sps:$4 sm:$0xff]  }
  0x37   : > { %2168 = vmatpush1.bf16.msra.mxu1 %v4606_v34  ;;  %v202_v34 = vld [vmem:[%s5257_s27 + $0xd8] sm:$0xff]  ;;  %v4680_v6 = vld [vmem:[%s7088_s1 + $0x6f0] ss:$24 sps:$4 sm:$0xff]  }
  0x38   : > { %2321 = vmatpush1.bf16.msra.mxu0 %v4607_v35  ;;  %2169 = vmatprep.subr.bf16.mxu1 %v4608_v36  ;;  %v208_v35 = vld [vmem:[%s5257_s27 + $0x108] sm:$0xff]  ;;  %v5387_v36 = vpack.c.bf16 %v193_v27, %v187_v26  ;;  %v4673_v48 = vld [vmem:[%s7088_s1 + $0x9c] ss:$24 sps:$4 sm:$0xff]   ;;  %v4671_v49 = vld [vmem:[%s7088_s1 + $0x98] ss:$24 sps:$4 sm:$0xff]  }
  0x39   : > { %2322 = vmatprep.subr.bf16.mxu0 %v4610_v37  ;;  %v5389_v37 = vpack.c.bf16 %v195_v29, %v189_v28  ;;  %v4683_v7 = vld [vmem:[%s7088_s1 + $0xf8] ss:$24 sps:$4 sm:$0xff]   ;;  %v231_v27 = vld [vmem:[%s5257_s27 + $0x1c0] sm:$0xff]  ;;  %v4694_v28 = vld [vmem:[%s7088_s1 + $0x754] ss:$24 sps:$4 sm:$0xff]  }
  0x3a   : > { %v225_v26 = vld [vmem:[%s5257_s27 + $0x190] sm:$0xff]  ;;  %v4713_v9 = vld [vmem:[%s7088_s1 + $0x1e8] ss:$24 sps:$4 sm:$0xff]  }
  0x3b   : > { %2170 = vmatpush1.bf16.msra.mxu1 %v4612_v38  ;;  %v4662_v38 = vld [vmem:[%s7088_s1 + $0x660] ss:$24 sps:$4 sm:$0xff]   ;;  %v4697_v29 = vld [vmem:[%s7088_s1 + $0x15c] ss:$24 sps:$4 sm:$0xff]  }
  0x3c   : > { %2323 = vmatpush1.bf16.msra.mxu0 %v4613_v39  ;;  %2171 = vmatprep.subr.bf16.mxu1 %v4614_v40  ;;  %v4665_v39 = vld [vmem:[%s7088_s1 + $0x68] ss:$24 sps:$4 sm:$0xff]   ;;  %v5397_v40 = vpack.c.bf16 %v206_v33, %v200_v32  ;;  %v238_v32 = vld [vmem:[%s5257_s27 + $0x1f8] sm:$0xff] }
  0x3d   : > { %2324 = vmatprep.subr.bf16.mxu0 %v4616_v41  ;;  %v5399_v41 = vpack.c.bf16 %v208_v35, %v202_v34  ;;  %v244_v33 = vld [vmem:[%s5257_s27 + $0x228] sm:$0xff]  ;;  %v4695_v35 = vld [vmem:[%s7088_s1 + $0x158] ss:$24 sps:$4 sm:$0xff]  }
  0x3e   : > { %v4692_v34 = vld [vmem:[%s7088_s1 + $0x750] ss:$24 sps:$4 sm:$0xff]  }
  0x3f   : > { %2172 = vmatpush1.bf16.msra.mxu1 %v4618_v42  ;;  %v199_v42 = vld [vmem:[%s5257_s27 + $0xc0] sm:$0xff] }
  0x40   : > { %2325 = vmatpush1.bf16.msra.mxu0 %v4619_v43  ;;  %2173 = vmatprep.subr.bf16.mxu1 %v4620_v44  ;;  %v205_v43 = vld [vmem:[%s5257_s27 + $0xf0] sm:$0xff] }
  0x41   : > { %2326 = vmatprep.subr.bf16.mxu0 %v4622_v45  ;;  %v201_v44 = vld [vmem:[%s5257_s27 + $0xd0] sm:$0xff]  ;;  %v207_v45 = vld [vmem:[%s5257_s27 + $0x100] sm:$0xff] }
  0x43   : > { %2174 = vmatpush1.bf16.msra.mxu1 %v4624_v50  ;;  %v212_v50 = vld [vmem:[%s5257_s27 + $0x128] sm:$0xff] }
  0x44   : > { %2327 = vmatpush1.bf16.msra.mxu0 %v4625_v51  ;;  %2175 = vmatprep.subr.bf16.mxu1 %v4626_v52  ;;  %v218_v51 = vld [vmem:[%s5257_s27 + $0x158] sm:$0xff] }
  0x45   : > { %2328 = vmatprep.subr.bf16.mxu0 %v4628_v55  ;;  %v214_v52 = vld [vmem:[%s5257_s27 + $0x138] sm:$0xff]  ;;  %v220_v55 = vld [vmem:[%s5257_s27 + $0x168] sm:$0xff] }
  0x47   : > { %2176 = vmatpush1.bf16.msra.mxu1 %v4630_v56  ;;  %v4676_v56 = vld [vmem:[%s7088_s1 + $0x6c4] ss:$24 sps:$4 sm:$0xff]  }
  0x48   : > { %2329 = vmatpush1.bf16.msra.mxu0 %v4631_v57  ;;  %2177 = vmatprep.subr.bf16.mxu1 %v4632_v58  ;;  %v4679_v57 = vld [vmem:[%s7088_s1 + $0xcc] ss:$24 sps:$4 sm:$0xff]   ;;  %v5431_v58 = vpack.c.bf16 %v205_v43, %v199_v42  ;;  %v5521_v43 = vpack.c.bf16 %v231_v27, %v225_v26  ;;  %v262_v26 = vld [vmem:[%s5257_s27 + $0x2b8] sm:$0xff] }
  0x49   : > { %2330 = vmatprep.subr.bf16.mxu0 %v4634_v59  ;;  %v5433_v59 = vpack.c.bf16 %v207_v45, %v201_v44  ;;  %v5525_v45 = vpack.c.bf16 %v244_v33, %v238_v32  ;;  %v268_v27 = vld [vmem:[%s5257_s27 + $0x2e8] sm:$0xff] }
  0x4b   : > { %2178 = vmatpush1.bf16.msra.mxu1 %v4636_v60  ;;  %v5435_v60 = vpack.c.bf16 %v218_v51, %v212_v50  ;;  %v237_v50 = vld [vmem:[%s5257_s27 + $0x1f0] sm:$0xff] }
  0x4c   : > { %2331 = vmatpush1.bf16.msra.mxu0 %v4637_v61  ;;  %2179 = vmatprep.subr.bf16.mxu1 %v4638_v62  ;;  %v5437_v61 = vpack.c.bf16 %v220_v55, %v214_v52  ;;  %v4674_v62 = vld [vmem:[%s7088_s1 + $0x6c0] ss:$24 sps:$4 sm:$0xff]   ;;  %v4706_v51 = vld [vmem:[%s7088_s1 + $0x7b4] ss:$24 sps:$4 sm:$0xff]  }
  0x4d   : > { %2332 = vmatprep.subr.bf16.mxu0 %v4640_v63  ;;  %v4677_v63 = vld [vmem:[%s7088_s1 + $0xc8] ss:$24 sps:$4 sm:$0xff]   ;;  %v4709_v52 = vld [vmem:[%s7088_s1 + $0x1bc] ss:$24 sps:$4 sm:$0xff]  }
  0x4e   : > { %v243_v55 = vld [vmem:[%s5257_s27 + $0x220] sm:$0xff] }
  0x4f   : > { %2180 = vmatpush1.bf16.msra.mxu1 %v4642_v0  ;;  %v211_v0 = vld [vmem:[%s5257_s27 + $0x120] sm:$0xff] }
  0x50   : > { %2333 = vmatpush1.bf16.msra.mxu0 %v4643_v1  ;;  %2181 = vmatprep.subr.bf16.mxu1 %v4644_v2  ;;  %v217_v1 = vld [vmem:[%s5257_s27 + $0x150] sm:$0xff] }
  0x51   : > { %2334 = vmatprep.subr.bf16.mxu0 %v4646_v3  ;;  %v213_v2 = vld [vmem:[%s5257_s27 + $0x130] sm:$0xff]  ;;  %v219_v3 = vld [vmem:[%s5257_s27 + $0x160] sm:$0xff]  ;;  %v5475_v14 = vpack.c.bf16 %v217_v1, %v211_v0 }
  0x52   : > { %v5477_v17 = vpack.c.bf16 %v219_v3, %v213_v2  ;;  %v4704_v0 = vld [vmem:[%s7088_s1 + $0x7b0] ss:$24 sps:$4 sm:$0xff]   ;;  %v4712_v2 = vld [vmem:[%s7088_s1 + $0x7e4] ss:$24 sps:$4 sm:$0xff]  }
  0x53   : > { %2182 = vmatpush1.bf16.msra.mxu1 %v4648_v4  ;;  %v4682_v4 = vld [vmem:[%s7088_s1 + $0x6f4] ss:$24 sps:$4 sm:$0xff]   ;;  %v4707_v1 = vld [vmem:[%s7088_s1 + $0x1b8] ss:$24 sps:$4 sm:$0xff]  }
  0x54   : > { %2335 = vmatpush1.bf16.msra.mxu0 %v4649_v5  ;;  %2610 = vmatprep.subr.bf16.mxu1 %v4655_v11  ;;  %v4685_v5 = vld [vmem:[%s7088_s1 + $0xfc] ss:$24 sps:$4 sm:$0xff]   ;;  %v232_v11 = vld [vmem:[%s5257_s27 + $0x1c8] sm:$0xff] }
  0x55   : > { %2457 = vmatprep.subr.bf16.mxu0 %v4652_v10  ;;  %v226_v10 = vld [vmem:[%s5257_s27 + $0x198] sm:$0xff]  ;;  %v4715_v3 = vld [vmem:[%s7088_s1 + $0x1ec] ss:$24 sps:$4 sm:$0xff]  }
  0x56   : > { %2184 = vmatmul.mubr.bf16.vlgmr.msra.gmra.mrb[0].mxu1 %v5346_v15  ;;  %v5481_v19 = vpack.c.bf16 %v232_v11, %v226_v10  ;;  %v247_v10 = vld [vmem:[%s5257_s27 + $0x240] sm:$0xff]  ;;  %v253_v11 = vld [vmem:[%s5257_s27 + $0x270] sm:$0xff] }
  0x57   : > { %2337 = vmatmul.mubr.bf16.vlgmr.msra.gmra.mrb[0].mxu0 %v5348_v16  ;;  %2611 = vmatpush1.bf16.msra.mxu1 %v4653_v13  ;;  %v4691_v13 = vld [vmem:[%s7088_s1 + $0x12c] ss:$24 sps:$4 sm:$0xff]   ;;  %v5607_v32 = vpack.c.bf16 %v253_v11, %v247_v10  ;;  %v4734_v10 = vld [vmem:[%s7088_s1 + $0x8a0] ss:$24 sps:$4 sm:$0xff]  }
  0x58   : > { %2458 = vmatpush1.bf16.msra.mxu0 %v4650_v12  ;;  %2612 = vmatprep.subr.bf16.mxu1 %v4661_v21  ;;  %v4688_v12 = vld [vmem:[%s7088_s1 + $0x724] ss:$24 sps:$4 sm:$0xff]   ;;  %v4689_v21 = vld [vmem:[%s7088_s1 + $0x128] ss:$24 sps:$4 sm:$0xff]  }
  0x59   : > { %2459 = vmatprep.subr.bf16.mxu0 %v4658_v20  ;;  %2193 = vmatprep.mubr.bf16.mxu1 %v5365_v24  ;;  %v4686_v20 = vld [vmem:[%s7088_s1 + $0x720] ss:$24 sps:$4 sm:$0xff]  }
  0x5a   : > { %2346 = vmatprep.mubr.bf16.mxu0 %v5367_v25  ;;  %v4737_v11 = vld [vmem:[%s7088_s1 + $0x2a8] ss:$24 sps:$4 sm:$0xff]  }
  0x5b   : > { %2613 = vmatpush1.bf16.msra.mxu1 %v4659_v23  ;;  %v229_v23 = vld [vmem:[%s5257_s27 + $0x1b0] sm:$0xff] }
  0x5c   : > { %2460 = vmatpush1.bf16.msra.mxu0 %v4656_v22  ;;  %2614 = vmatprep.subr.bf16.mxu1 %v4667_v31  ;;  %v223_v22 = vld [vmem:[%s5257_s27 + $0x180] sm:$0xff]  ;;  %v242_v31 = vld [vmem:[%s5257_s27 + $0x218] sm:$0xff] }
  0x5d   : > { %2461 = vmatprep.subr.bf16.mxu0 %v4664_v30  ;;  %v236_v30 = vld [vmem:[%s5257_s27 + $0x1e8] sm:$0xff]  ;;  %v5519_v42 = vpack.c.bf16 %v229_v23, %v223_v22  ;;  %v266_v23 = vld [vmem:[%s5257_s27 + $0x2d8] sm:$0xff] }
  0x5e   : > { %2194 = vmatmul.mubr.bf16.gmra.mrb[4].mxu1 %v5387_v36  ;;  %v5523_v44 = vpack.c.bf16 %v242_v31, %v236_v30  ;;  %v260_v22 = vld [vmem:[%s5257_s27 + $0x2a8] sm:$0xff]  ;;  %v4724_v30 = vld [vmem:[%s7088_s1 + $0x844] ss:$24 sps:$4 sm:$0xff]  }
  0x5f   : > { %2347 = vmatmul.mubr.bf16.gmra.mrb[4].mxu0 %v5389_v37  ;;  %2615 = vmatpush1.bf16.msra.mxu1 %v4665_v39  ;;  %v4703_v39 = vld [vmem:[%s7088_s1 + $0x18c] ss:$24 sps:$4 sm:$0xff]  }
  0x60   : > { %2462 = vmatpush1.bf16.msra.mxu0 %v4662_v38  ;;  %2203 = vmatprep.mubr.bf16.mxu1 %v5397_v40  ;;  %v4700_v38 = vld [vmem:[%s7088_s1 + $0x784] ss:$24 sps:$4 sm:$0xff]  }
  0x61   : > { %2356 = vmatprep.mubr.bf16.mxu0 %v5399_v41  ;;  %2463 = vmatprep.subr.bf16.mxu0 %v4670_v47  ;;  %v4701_v47 = vld [vmem:[%s7088_s1 + $0x188] ss:$24 sps:$4 sm:$0xff]   ;;  %v4727_v31 = vld [vmem:[%s7088_s1 + $0x24c] ss:$24 sps:$4 sm:$0xff]  }
  0x62   : > { %2616 = vmatprep.subr.bf16.mxu1 %v4673_v48  ;;  %v235_v48 = vld [vmem:[%s5257_s27 + $0x1e0] sm:$0xff] }
  0x63   : > { %2617 = vmatpush1.bf16.msra.mxu1 %v4671_v49  ;;  %v241_v49 = vld [vmem:[%s5257_s27 + $0x210] sm:$0xff] }
  0x64   : > { %2464 = vmatpush1.bf16.msra.mxu0 %v4668_v46  ;;  %2618 = vmatprep.subr.bf16.mxu1 %v4679_v57  ;;  %v4698_v46 = vld [vmem:[%s7088_s1 + $0x780] ss:$24 sps:$4 sm:$0xff]  }
  0x65   : > { %2465 = vmatprep.subr.bf16.mxu0 %v4676_v56  ;;  %v248_v56 = vld [vmem:[%s5257_s27 + $0x248] sm:$0xff]  ;;  %v254_v57 = vld [vmem:[%s5257_s27 + $0x278] sm:$0xff] }
  0x66   : > { %2204 = vmatmul.mubr.bf16.gmra.mrb[8].mxu1 %v5431_v58 }
  0x67   : > { %2357 = vmatmul.mubr.bf16.gmra.mrb[8].mxu0 %v5433_v59  ;;  %2213 = vmatprep.mubr.bf16.mxu1 %v5435_v60 }
  0x68   : > { %2366 = vmatprep.mubr.bf16.mxu0 %v5437_v61  ;;  %2466 = vmatpush1.bf16.msra.mxu0 %v4674_v62  ;;  %v250_v62 = vld [vmem:[%s5257_s27 + $0x258] sm:$0xff] }
  0x69   : > { %2619 = vmatpush1.bf16.msra.mxu1 %v4677_v63  ;;  %2467 = vmatprep.subr.bf16.mxu0 %v4682_v4  ;;  %v256_v63 = vld [vmem:[%s5257_s27 + $0x288] sm:$0xff]  ;;  %v5563_v4 = vpack.c.bf16 %v241_v49, %v235_v48  ;;  %v261_v48 = vld [vmem:[%s5257_s27 + $0x2b0] sm:$0xff]  ;;  %v267_v49 = vld [vmem:[%s5257_s27 + $0x2e0] sm:$0xff] }
  0x6a   : > { %2620 = vmatprep.subr.bf16.mxu1 %v4685_v5  ;;  %v5565_v5 = vpack.c.bf16 %v243_v55, %v237_v50  ;;  %v4730_v50 = vld [vmem:[%s7088_s1 + $0x874] ss:$24 sps:$4 sm:$0xff]   ;;  %v278_v55 = vld [vmem:[%s5257_s27 + $0x338] sm:$0xff] }
  0x6c   : > { %2468 = vmatpush1.bf16.msra.mxu0 %v4680_v6  ;;  %v5567_v6 = vpack.c.bf16 %v254_v57, %v248_v56  ;;  %v274_v56 = vld [vmem:[%s5257_s27 + $0x318] sm:$0xff]  ;;  %v280_v57 = vld [vmem:[%s5257_s27 + $0x348] sm:$0xff] }
  0x6d   : > { %2621 = vmatpush1.bf16.msra.mxu1 %v4683_v7  ;;  %2469 = vmatprep.subr.bf16.mxu0 %v4688_v12  ;;  %v5569_v7 = vpack.c.bf16 %v256_v63, %v250_v62  ;;  %v249_v12 = vld [vmem:[%s5257_s27 + $0x250] sm:$0xff] }
  0x6e   : > { %2622 = vmatprep.subr.bf16.mxu1 %v4691_v13  ;;  %2214 = vmatmul.mubr.bf16.gmra.mrb[12].mxu1 %v5475_v14  ;;  %v4718_v13 = vld [vmem:[%s7088_s1 + $0x814] ss:$24 sps:$4 sm:$0xff]   ;;  %v4728_v62 = vld [vmem:[%s7088_s1 + $0x870] ss:$24 sps:$4 sm:$0xff]  }
  0x6f   : > { %2367 = vmatmul.mubr.bf16.gmra.mrb[12].mxu0 %v5477_v17  ;;  %2223 = vmatprep.mubr.bf16.mxu1 %v5479_v18  ;;  %v4731_v63 = vld [vmem:[%s7088_s1 + $0x278] ss:$24 sps:$4 sm:$0xff]  }
  0x70   : > { %2376 = vmatprep.mubr.bf16.mxu0 %v5481_v19  ;;  %2470 = vmatpush1.bf16.msra.mxu0 %v4686_v20  ;;  %v4721_v20 = vld [vmem:[%s7088_s1 + $0x21c] ss:$24 sps:$4 sm:$0xff]  }
  0x71   : > { %2623 = vmatpush1.bf16.msra.mxu1 %v4689_v21  ;;  %2471 = vmatprep.subr.bf16.mxu0 %v4694_v28  ;;  %v255_v21 = vld [vmem:[%s5257_s27 + $0x280] sm:$0xff]  ;;  %v4716_v28 = vld [vmem:[%s7088_s1 + $0x810] ss:$24 sps:$4 sm:$0xff]  }
  0x72   : > { %2624 = vmatprep.subr.bf16.mxu1 %v4697_v29  ;;  %v4719_v29 = vld [vmem:[%s7088_s1 + $0x218] ss:$24 sps:$4 sm:$0xff]   ;;  %v5609_v33 = vpack.c.bf16 %v255_v21, %v249_v12  ;;  %v271_v12 = vld [vmem:[%s5257_s27 + $0x300] sm:$0xff] }
  0x73   : > { %v279_v21 = vld [vmem:[%s5257_s27 + $0x340] sm:$0xff] }
  0x74   : > { %2472 = vmatpush1.bf16.msra.mxu0 %v4692_v34  ;;  %v5611_v34 = vpack.c.bf16 %v266_v23, %v260_v22  ;;  %v4742_v22 = vld [vmem:[%s7088_s1 + $0x8d4] ss:$24 sps:$4 sm:$0xff]  }
  0x75   : > { %2625 = vmatpush1.bf16.msra.mxu1 %v4695_v35  ;;  %2473 = vmatprep.subr.bf16.mxu0 %v4700_v38  ;;  %v5613_v35 = vpack.c.bf16 %v268_v27, %v262_v26  ;;  %v4722_v38 = vld [vmem:[%s7088_s1 + $0x840] ss:$24 sps:$4 sm:$0xff]   ;;  %v4745_v23 = vld [vmem:[%s7088_s1 + $0x2dc] ss:$24 sps:$4 sm:$0xff]   ;;  %v284_v26 = vld [vmem:[%s5257_s27 + $0x368] sm:$0xff] }
  0x76   : > { %2626 = vmatprep.subr.bf16.mxu1 %v4703_v39  ;;  %2224 = vmatmul.mubr.bf16.gmra.mrb[16].mxu1 %v5519_v42  ;;  %v4725_v39 = vld [vmem:[%s7088_s1 + $0x248] ss:$24 sps:$4 sm:$0xff]   ;;  %v290_v27 = vld [vmem:[%s5257_s27 + $0x398] sm:$0xff] }
  0x77   : > { %2377 = vmatmul.mubr.bf16.gmra.mrb[16].mxu0 %v5521_v43  ;;  %2233 = vmatprep.mubr.bf16.mxu1 %v5523_v44 }
  0x78   : > { %2386 = vmatprep.mubr.bf16.mxu0 %v5525_v45  ;;  %2474 = vmatpush1.bf16.msra.mxu0 %v4698_v46  ;;  %v259_v46 = vld [vmem:[%s5257_s27 + $0x2a0] sm:$0xff] }
  0x79   : > { %2627 = vmatpush1.bf16.msra.mxu1 %v4701_v47  ;;  %2475 = vmatprep.subr.bf16.mxu0 %v4706_v51  ;;  %v265_v47 = vld [vmem:[%s5257_s27 + $0x2d0] sm:$0xff] }
  0x7a   : > { %2628 = vmatprep.subr.bf16.mxu1 %v4709_v52  ;;  %v4733_v51 = vld [vmem:[%s7088_s1 + $0x27c] ss:$24 sps:$4 sm:$0xff]   ;;  %v272_v52 = vld [vmem:[%s5257_s27 + $0x308] sm:$0xff] }
  0x7c   : > { %2476 = vmatpush1.bf16.msra.mxu0 %v4704_v0  ;;  %v4736_v0 = vld [vmem:[%s7088_s1 + $0x8a4] ss:$24 sps:$4 sm:$0xff]  }
  0x7d   : > { %2629 = vmatpush1.bf16.msra.mxu1 %v4707_v1  ;;  %2477 = vmatprep.subr.bf16.mxu0 %v4712_v2  ;;  %v4739_v1 = vld [vmem:[%s7088_s1 + $0x2ac] ss:$24 sps:$4 sm:$0xff]   ;;  %v5651_v2 = vpack.c.bf16 %v265_v47, %v259_v46 }
  0x7e   : > { %2630 = vmatprep.subr.bf16.mxu1 %v4715_v3  ;;  %2234 = vmatmul.mubr.bf16.gmra.mrb[20].mxu1 %v5563_v4  ;;  %v5653_v3 = vpack.c.bf16 %v267_v49, %v261_v48  ;;  %v5699_v48 = vpack.c.bf16 %v290_v27, %v284_v26  ;;  %v310_v26 = vld [vmem:[%s5257_s27 + $0x438] sm:$0xff]  ;;  %v316_v27 = vld [vmem:[%s5257_s27 + $0x468] sm:$0xff] }
  0x7f   : > { %2387 = vmatmul.mubr.bf16.gmra.mrb[20].mxu0 %v5565_v5  ;;  %2243 = vmatprep.mubr.bf16.mxu1 %v5567_v6 }
  0x80   : > { %2396 = vmatprep.mubr.bf16.mxu0 %v5569_v7  ;;  %2478 = vmatpush1.bf16.msra.mxu0 %v4710_v8  ;;  %v5655_v8 = vpack.c.bf16 %v278_v55, %v272_v52  ;;  %v285_v52 = vld [vmem:[%s5257_s27 + $0x370] sm:$0xff]  ;;  %v291_v55 = vld [vmem:[%s5257_s27 + $0x3a0] sm:$0xff] }
  0x81   : > { %2631 = vmatpush1.bf16.msra.mxu1 %v4713_v9  ;;  %2479 = vmatprep.subr.bf16.mxu0 %v4718_v13  ;;  %v5657_v9 = vpack.c.bf16 %v280_v57, %v274_v56  ;;  %v277_v13 = vld [vmem:[%s5257_s27 + $0x330] sm:$0xff]  ;;  %v296_v56 = vld [vmem:[%s5257_s27 + $0x3c8] sm:$0xff]  ;;  %v302_v57 = vld [vmem:[%s5257_s27 + $0x3f8] sm:$0xff] }
  0x82   : > { %2632 = vmatprep.subr.bf16.mxu1 %v4721_v20  ;;  %v273_v20 = vld [vmem:[%s5257_s27 + $0x310] sm:$0xff]  ;;  %v5695_v46 = vpack.c.bf16 %v277_v13, %v271_v12  ;;  %v295_v12 = vld [vmem:[%s5257_s27 + $0x3c0] sm:$0xff] }
  0x83   : > { %v5697_v47 = vpack.c.bf16 %v279_v21, %v273_v20  ;;  %v301_v13 = vld [vmem:[%s5257_s27 + $0x3f0] sm:$0xff]  ;;  %v303_v21 = vld [vmem:[%s5257_s27 + $0x400] sm:$0xff] }
  0x84   : > { %2480 = vmatpush1.bf16.msra.mxu0 %v4716_v28  ;;  %v286_v28 = vld [vmem:[%s5257_s27 + $0x378] sm:$0xff]  ;;  %v297_v20 = vld [vmem:[%s5257_s27 + $0x3d0] sm:$0xff] }
  0x85   : > { %2633 = vmatpush1.bf16.msra.mxu1 %v4719_v29  ;;  %2481 = vmatprep.subr.bf16.mxu0 %v4724_v30  ;;  %v292_v29 = vld [vmem:[%s5257_s27 + $0x3a8] sm:$0xff] }
  0x86   : > { %2634 = vmatprep.subr.bf16.mxu1 %v4727_v31  ;;  %2244 = vmatmul.mubr.bf16.gmra.mrb[24].mxu1 %v5607_v32  ;;  %v4740_v30 = vld [vmem:[%s7088_s1 + $0x8d0] ss:$24 sps:$4 sm:$0xff]   ;;  %v5701_v49 = vpack.c.bf16 %v292_v29, %v286_v28  ;;  %v5735_v28 = vpack.c.bf16 %v301_v13, %v295_v12  ;;  %v5737_v29 = vpack.c.bf16 %v303_v21, %v297_v20 }
  0x87   : > { %2397 = vmatmul.mubr.bf16.gmra.mrb[24].mxu0 %v5609_v33  ;;  %2253 = vmatprep.mubr.bf16.mxu1 %v5611_v34  ;;  %v4743_v31 = vld [vmem:[%s7088_s1 + $0x2d8] ss:$24 sps:$4 sm:$0xff]   ;;  %v4746_v13 = vld [vmem:[%s7088_s1 + $0x308] ss:$24 sps:$4 sm:$0xff]  }
  0x88   : > { %2406 = vmatprep.mubr.bf16.mxu0 %v5613_v35  ;;  %2482 = vmatpush1.bf16.msra.mxu0 %v4722_v38  ;;  %v4748_v38 = vld [vmem:[%s7088_s1 + $0x30c] ss:$24 sps:$4 sm:$0xff]   ;;  %v185_v12 = vld [vmem:[%s5257_s27 + $0x50] sm:$0xff] }
  0x89   : > { %2635 = vmatpush1.bf16.msra.mxu1 %v4725_v39  ;;  %2483 = vmatprep.subr.bf16.mxu0 %v4730_v50  ;;  %v4751_v39 = vld [vmem:[%s7088_s1 + $0x14] ss:$24 sps:$4 sm:$0xff]   ;;  %v283_v50 = vld [vmem:[%s5257_s27 + $0x360] sm:$0xff] }
  0x8a   : > { %2636 = vmatprep.subr.bf16.mxu1 %v4733_v51  ;;  %v289_v51 = vld [vmem:[%s5257_s27 + $0x390] sm:$0xff]  ;;  %v192_v21 = vld [vmem:[%s5257_s27 + $0x88] sm:$0xff] }
  0x8c   : > { %2484 = vmatpush1.bf16.msra.mxu0 %v4728_v62  ;;  %v298_v62 = vld [vmem:[%s5257_s27 + $0x3d8] sm:$0xff] }
  0x8d   : > { %2637 = vmatpush1.bf16.msra.mxu1 %v4731_v63  ;;  %2485 = vmatprep.subr.bf16.mxu0 %v4736_v0  ;;  %v304_v63 = vld [vmem:[%s5257_s27 + $0x408] sm:$0xff]  ;;  %v5715_v0 = vpack.c.bf16 %v289_v51, %v283_v50  ;;  %v309_v50 = vld [vmem:[%s5257_s27 + $0x430] sm:$0xff]  ;;  %v315_v51 = vld [vmem:[%s5257_s27 + $0x460] sm:$0xff] }
  0x8e   : > { %2638 = vmatprep.subr.bf16.mxu1 %v4739_v1  ;;  %2254 = vmatmul.mubr.bf16.gmra.mrb[28].mxu1 %v5651_v2  ;;  %v5717_v1 = vpack.c.bf16 %v291_v55, %v285_v52  ;;  %v180_v52 = vld [vmem:[%s5257_s27 + $0x28] sm:$0xff]  ;;  %v186_v55 = vld [vmem:[%s5257_s27 + $0x58] sm:$0xff] }
  0x8f   : > { %2407 = vmatmul.mubr.bf16.gmra.mrb[28].mxu0 %v5653_v3  ;;  %2263 = vmatprep.mubr.bf16.mxu1 %v5655_v8 }
  0x90   : > { %2416 = vmatprep.mubr.bf16.mxu0 %v5657_v9  ;;  %2486 = vmatpush1.bf16.msra.mxu0 %v4734_v10  ;;  %v5719_v10 = vpack.c.bf16 %v302_v57, %v296_v56  ;;  %v5755_v57 = vpack.c.bf16 %v315_v51, %v309_v50  ;;  %v191_v51 = vld [vmem:[%s5257_s27 + $0x80] sm:$0xff] }
  0x91   : > { %2639 = vmatpush1.bf16.msra.mxu1 %v4737_v11  ;;  %2487 = vmatprep.subr.bf16.mxu0 %v4742_v22  ;;  %v5721_v11 = vpack.c.bf16 %v304_v63, %v298_v62  ;;  %v308_v22 = vld [vmem:[%s5257_s27 + $0x428] sm:$0xff]  ;;  %v5757_v62 = vpack.c.bf16 %v186_v55, %v180_v52  ;;  %v179_v63 = vld [vmem:[%s5257_s27 + $0x20] sm:$0xff]  ;;  %v197_v52 = vld [vmem:[%s5257_s27 + $0xb0] sm:$0xff] }
  0x92   : > { %2640 = vmatprep.subr.bf16.mxu1 %v4745_v23  ;;  %v314_v23 = vld [vmem:[%s5257_s27 + $0x458] sm:$0xff]  ;;  %7144 = vst [vmem:[#allocation6_spill] sm:$0xff] %v5755_v57  ;;  %v5768_v20 = vpack.c.bf16 %v185_v12, %v179_v63  ;;  %v4760_v55 = vld [vmem:[%s7088_s1 + $0x36c] ss:$24 sps:$4 sm:$0xff]  }
  0x93   : > { %7145 = vst [vmem:[#allocation7_spill] sm:$0xff] %v5757_v62  ;;  %v4763_v63 = vld [vmem:[%s7088_s1 + $0x74] ss:$24 sps:$4 sm:$0xff]  }
  0x94   : > { %2488 = vmatpush1.bf16.msra.mxu0 %v4740_v30  ;;  %v5739_v30 = vpack.c.bf16 %v314_v23, %v308_v22  ;;  %7146 = vst [vmem:[#allocation8_spill] sm:$0xff] %v5768_v20  ;;  %v198_v22 = vld [vmem:[%s5257_s27 + $0xb8] sm:$0xff]  ;;  %v4749_v23 = vld [vmem:[%s7088_s1 + $0x10] ss:$24 sps:$4 sm:$0xff]  }
  0x95   : > { %2641 = vmatpush1.bf16.msra.mxu1 %v4743_v31  ;;  %3069 = vmatprep.subr.bf16.mxu0 %v4751_v39  ;;  %v5741_v31 = vpack.c.bf16 %v316_v27, %v310_v26  ;;  %v313_v39 = vld [vmem:[%s5257_s27 + $0x450] sm:$0xff]  ;;  %v4757_v27 = vld [vmem:[%s7088_s1 + $0x44] ss:$24 sps:$4 sm:$0xff]   ;;  %v5787_v50 = vpack.c.bf16 %v198_v22, %v192_v21  ;;  %v204_v12 = vld [vmem:[%s5257_s27 + $0xe8] sm:$0xff] }
  0x96   : > { %2763 = vmatprep.subr.bf16.mxu1 %v4748_v38  ;;  %2264 = vmatmul.mubr.bf16.gmra.mrb[32].mxu1 %v5695_v46  ;;  %v307_v38 = vld [vmem:[%s5257_s27 + $0x420] sm:$0xff]  ;;  %v4754_v26 = vld [vmem:[%s7088_s1 + $0x33c] ss:$24 sps:$4 sm:$0xff]  }
  0x97   : > { %2417 = vmatmul.mubr.bf16.gmra.mrb[32].mxu0 %v5697_v47  ;;  %2273 = vmatprep.mubr.bf16.mxu1 %v5699_v48  ;;  %7143 = vst [vmem:[#allocation5_spill] sm:$0xff] %v5741_v31  ;;  %v5753_v56 = vpack.c.bf16 %v313_v39, %v307_v38  ;;  %v4752_v38 = vld [vmem:[%s7088_s1 + $0x338] ss:$24 sps:$4 sm:$0xff]   ;;  %7147 = vst [vmem:[#allocation9_spill] sm:$0xff] %v5787_v50  ;;  %v4758_v22 = vld [vmem:[%s7088_s1 + $0x368] ss:$24 sps:$4 sm:$0xff]  }
  0x98   : > { %2426 = vmatprep.mubr.bf16.mxu0 %v5701_v49  ;;  %v4755_v39 = vld [vmem:[%s7088_s1 + $0x40] ss:$24 sps:$4 sm:$0xff]  }
  0x99   : > { %v210_v21 = vld [vmem:[%s5257_s27 + $0x118] sm:$0xff] }
  0x9e   : > { %2274 = vmatmul.mubr.bf16.gmra.mrb[36].mxu1 %v5715_v0 }
  0x9f   : > { %2427 = vmatmul.mubr.bf16.gmra.mrb[36].mxu0 %v5717_v1  ;;  %2283 = vmatprep.mubr.bf16.mxu1 %v5719_v10 }
  0xa0   : > { %2436 = vmatprep.mubr.bf16.mxu0 %v5721_v11 }
  0xa6   : > { %2284 = vmatmul.mubr.bf16.gmra.mrb[40].mxu1 %v5735_v28 }
  0xa7   : > { %2437 = vmatmul.mubr.bf16.gmra.mrb[40].mxu0 %v5737_v29  ;;  %2293 = vmatprep.mubr.bf16.mxu1 %v5739_v30 }
  0xa8   : > { %2446 = vmatprep.mubr.bf16.mxu0 %v5741_v31 }
  0xae   : > { %2294 = vmatmul.mubr.bf16.gmra.mrb[44].mxu1 %v5753_v56 }
  0xaf   : > { %2447 = vmatmul.mubr.bf16.gmra.mrb[44].mxu0 %v5755_v57  ;;  %2642 = vmatprep.mubr.bf16.mxu1 %v5278_v53 }
  0xb0   : > { %2489 = vmatprep.mubr.bf16.mxu0 %v5757_v62  ;;  %v293_v62 = vld [vmem:[%s5257_s27 + $0x3b0] sm:$0xff] }
  0xb6   : > { %2643 = vmatmul.mubr.bf16.vlgmr.msra.gmra.mrb[48].mxu1 %v5346_v15 }
  0xb7   : > { %2490 = vmatmul.mubr.bf16.vlgmr.msra.gmra.mrb[0].mxu0 %v5768_v20  ;;  %2764 = vmatpush1.bf16.msra.mxu1 %v4746_v13  ;;  %v5803_v13 = vpack.c.bf16 %v197_v52, %v191_v51  ;;  %v4764_v51 = vld [vmem:[%s7088_s1 + $0x398] ss:$24 sps:$4 sm:$0xff]   ;;  %v4838_v20 = vld [vmem:[%s7088_s1 + $0x5dc] ss:$24 sps:$4 sm:$0xff]  }
  0xb8   : > { %3070 = vmatpush1.bf16.msra.mxu0 %v4749_v23  ;;  %2765 = vmatprep.subr.bf16.mxu1 %v4754_v26  ;;  %v4761_v23 = vld [vmem:[%s7088_s1 + $0x70] ss:$24 sps:$4 sm:$0xff]   ;;  %v5811_v26 = vpack.c.bf16 %v210_v21, %v204_v12  ;;  %v4767_v52 = vld [vmem:[%s7088_s1 + $0xa0] ss:$24 sps:$4 sm:$0xff]   ;;  %v4772_v12 = vld [vmem:[%s7088_s1 + $0x3cc] ss:$24 sps:$4 sm:$0xff]  }
  0xb9   : > { %3071 = vmatprep.subr.bf16.mxu0 %v4757_v27  ;;  %2499 = vmatprep.mubr.bf16.mxu0 %v5787_v50  ;;  %7148 = vst [vmem:[#allocation10_spill] sm:$0xff] %v5803_v13  ;;  %v203_v27 = vld [vmem:[%s5257_s27 + $0xe0] sm:$0xff]  ;;  %v209_v50 = vld [vmem:[%s5257_s27 + $0x110] sm:$0xff] }
  0xba   : > { %2652 = vmatprep.mubr.bf16.mxu1 %v5365_v24  ;;  %7149 = vst [vmem:[#allocation11_spill] sm:$0xff] %v5811_v26  ;;  %v4775_v21 = vld [vmem:[%s7088_s1 + $0xd4] ss:$24 sps:$4 sm:$0xff]  }
  0xbb   : > { %2766 = vmatpush1.bf16.msra.mxu1 %v4752_v38  ;;  %v4766_v38 = vld [vmem:[%s7088_s1 + $0x39c] ss:$24 sps:$4 sm:$0xff]  }
  0xbc   : > { %3072 = vmatpush1.bf16.msra.mxu0 %v4755_v39  ;;  %2767 = vmatprep.subr.bf16.mxu1 %v4760_v55  ;;  %v4769_v39 = vld [vmem:[%s7088_s1 + $0xa4] ss:$24 sps:$4 sm:$0xff]   ;;  %v216_v55 = vld [vmem:[%s5257_s27 + $0x148] sm:$0xff] }
  0xbd   : > { %3073 = vmatprep.subr.bf16.mxu0 %v4763_v63  ;;  %v222_v63 = vld [vmem:[%s5257_s27 + $0x178] sm:$0xff] }
  0xbe   : > { %2653 = vmatmul.mubr.bf16.gmra.mrb[52].mxu1 %v5387_v36 }
  0xbf   : > { %2500 = vmatmul.mubr.bf16.gmra.mrb[4].mxu0 %v5803_v13  ;;  %2768 = vmatpush1.bf16.msra.mxu1 %v4758_v22  ;;  %v5839_v22 = vpack.c.bf16 %v209_v50, %v203_v27  ;;  %v4770_v13 = vld [vmem:[%s7088_s1 + $0x3c8] ss:$24 sps:$4 sm:$0xff]   ;;  %v4778_v50 = vld [vmem:[%s7088_s1 + $0x3fc] ss:$24 sps:$4 sm:$0xff]  }
  0xc0   : > { %3074 = vmatpush1.bf16.msra.mxu0 %v4761_v23  ;;  %2509 = vmatprep.mubr.bf16.mxu0 %v5811_v26  ;;  %v5841_v23 = vpack.c.bf16 %v222_v63, %v216_v55  ;;  %v4773_v26 = vld [vmem:[%s7088_s1 + $0xd0] ss:$24 sps:$4 sm:$0xff]   ;;  %v4781_v27 = vld [vmem:[%s7088_s1 + $0x104] ss:$24 sps:$4 sm:$0xff]  }
  0xc1   : > { %2662 = vmatprep.mubr.bf16.mxu1 %v5397_v40  ;;  %2769 = vmatprep.subr.bf16.mxu1 %v4766_v38  ;;  %7150 = vst [vmem:[#allocation12_spill] sm:$0xff] %v5839_v22  ;;  %v215_v38 = vld [vmem:[%s5257_s27 + $0x140] sm:$0xff]  ;;  %v228_v55 = vld [vmem:[%s5257_s27 + $0x1a8] sm:$0xff]  ;;  %v234_v63 = vld [vmem:[%s5257_s27 + $0x1d8] sm:$0xff] }
  0xc2   : > { %3075 = vmatprep.subr.bf16.mxu0 %v4769_v39  ;;  %7151 = vst [vmem:[#allocation13_spill] sm:$0xff] %v5841_v23  ;;  %v221_v39 = vld [vmem:[%s5257_s27 + $0x170] sm:$0xff] }
  0xc3   : > { %2770 = vmatpush1.bf16.msra.mxu1 %v4764_v51  ;;  %v4776_v51 = vld [vmem:[%s7088_s1 + $0x3f8] ss:$24 sps:$4 sm:$0xff]  }
  0xc4   : > { %3076 = vmatpush1.bf16.msra.mxu0 %v4767_v52  ;;  %2771 = vmatprep.subr.bf16.mxu1 %v4772_v12  ;;  %v4779_v52 = vld [vmem:[%s7088_s1 + $0x100] ss:$24 sps:$4 sm:$0xff]   ;;  %v4784_v12 = vld [vmem:[%s7088_s1 + $0x42c] ss:$24 sps:$4 sm:$0xff]  }
  0xc5   : > { %3077 = vmatprep.subr.bf16.mxu0 %v4775_v21  ;;  %v4787_v21 = vld [vmem:[%s7088_s1 + $0x134] ss:$24 sps:$4 sm:$0xff]  }
  0xc6   : > { %2663 = vmatmul.mubr.bf16.gmra.mrb[56].mxu1 %v5431_v58 }
  0xc7   : > { %2510 = vmatmul.mubr.bf16.gmra.mrb[8].mxu0 %v5839_v22  ;;  %2672 = vmatprep.mubr.bf16.mxu1 %v5435_v60  ;;  %v5877_v22 = vpack.c.bf16 %v234_v63, %v228_v55  ;;  %v4788_v55 = vld [vmem:[%s7088_s1 + $0x458] ss:$24 sps:$4 sm:$0xff]  }
  0xc8   : > { %2519 = vmatprep.mubr.bf16.mxu0 %v5841_v23  ;;  %2772 = vmatpush1.bf16.msra.mxu1 %v4770_v13  ;;  %v5875_v23 = vpack.c.bf16 %v221_v39, %v215_v38  ;;  %v4782_v13 = vld [vmem:[%s7088_s1 + $0x428] ss:$24 sps:$4 sm:$0xff]   ;;  %v4790_v38 = vld [vmem:[%s7088_s1 + $0x45c] ss:$24 sps:$4 sm:$0xff]  }
  0xc9   : > { %3078 = vmatpush1.bf16.msra.mxu0 %v4773_v26  ;;  %2773 = vmatprep.subr.bf16.mxu1 %v4778_v50  ;;  %7153 = vst [vmem:[#allocation15_spill] sm:$0xff] %v5877_v22  ;;  %v4785_v26 = vld [vmem:[%s7088_s1 + $0x130] ss:$24 sps:$4 sm:$0xff]   ;;  %v227_v50 = vld [vmem:[%s5257_s27 + $0x1a0] sm:$0xff] }
  0xca   : > { %3079 = vmatprep.subr.bf16.mxu0 %v4781_v27  ;;  %7152 = vst [vmem:[#allocation14_spill] sm:$0xff] %v5875_v23  ;;  %v233_v27 = vld [vmem:[%s5257_s27 + $0x1d0] sm:$0xff]  ;;  %v4793_v39 = vld [vmem:[%s7088_s1 + $0x164] ss:$24 sps:$4 sm:$0xff]   ;;  %v4791_v63 = vld [vmem:[%s7088_s1 + $0x160] ss:$24 sps:$4 sm:$0xff]  }
  0xcc   : > { %2774 = vmatpush1.bf16.msra.mxu1 %v4776_v51  ;;  %v240_v51 = vld [vmem:[%s5257_s27 + $0x208] sm:$0xff] }
  0xcd   : > { %3080 = vmatpush1.bf16.msra.mxu0 %v4779_v52  ;;  %2775 = vmatprep.subr.bf16.mxu1 %v4784_v12  ;;  %v246_v52 = vld [vmem:[%s5257_s27 + $0x238] sm:$0xff]  ;;  %v4796_v12 = vld [vmem:[%s7088_s1 + $0x48c] ss:$24 sps:$4 sm:$0xff]  }
  0xce   : > { %3081 = vmatprep.subr.bf16.mxu0 %v4787_v21  ;;  %2673 = vmatmul.mubr.bf16.gmra.mrb[60].mxu1 %v5475_v14  ;;  %v4799_v21 = vld [vmem:[%s7088_s1 + $0x194] ss:$24 sps:$4 sm:$0xff]  }
  0xcf   : > { %2520 = vmatmul.mubr.bf16.gmra.mrb[12].mxu0 %v5875_v23  ;;  %2682 = vmatprep.mubr.bf16.mxu1 %v5479_v18  ;;  %v245_v23 = vld [vmem:[%s5257_s27 + $0x230] sm:$0xff] }
  0xd0   : > { %2529 = vmatprep.mubr.bf16.mxu0 %v5877_v22  ;;  %2776 = vmatpush1.bf16.msra.mxu1 %v4782_v13  ;;  %v5911_v13 = vpack.c.bf16 %v233_v27, %v227_v50  ;;  %v239_v22 = vld [vmem:[%s5257_s27 + $0x200] sm:$0xff]  ;;  %v4802_v50 = vld [vmem:[%s7088_s1 + $0x4bc] ss:$24 sps:$4 sm:$0xff]  }
  0xd1   : > { %3082 = vmatpush1.bf16.msra.mxu0 %v4785_v26  ;;  %2777 = vmatprep.subr.bf16.mxu1 %v4790_v38  ;;  %v5913_v26 = vpack.c.bf16 %v246_v52, %v240_v51  ;;  %v4794_v38 = vld [vmem:[%s7088_s1 + $0x488] ss:$24 sps:$4 sm:$0xff]   ;;  %v4805_v27 = vld [vmem:[%s7088_s1 + $0x1c4] ss:$24 sps:$4 sm:$0xff]  }
  0xd2   : > { %3083 = vmatprep.subr.bf16.mxu0 %v4793_v39  ;;  %7154 = vst [vmem:[#allocation16_spill] sm:$0xff] %v5911_v13  ;;  %v4797_v39 = vld [vmem:[%s7088_s1 + $0x190] ss:$24 sps:$4 sm:$0xff]   ;;  %v258_v52 = vld [vmem:[%s5257_s27 + $0x298] sm:$0xff] }
  0xd3   : > { %7155 = vst [vmem:[#allocation17_spill] sm:$0xff] %v5913_v26  ;;  %v252_v51 = vld [vmem:[%s5257_s27 + $0x268] sm:$0xff] }
  0xd4   : > { %2778 = vmatpush1.bf16.msra.mxu1 %v4788_v55  ;;  %v4800_v55 = vld [vmem:[%s7088_s1 + $0x4b8] ss:$24 sps:$4 sm:$0xff]  }
  0xd5   : > { %3084 = vmatpush1.bf16.msra.mxu0 %v4791_v63  ;;  %2779 = vmatprep.subr.bf16.mxu1 %v4796_v12  ;;  %v4803_v63 = vld [vmem:[%s7088_s1 + $0x1c0] ss:$24 sps:$4 sm:$0xff]   ;;  %v4808_v12 = vld [vmem:[%s7088_s1 + $0x4ec] ss:$24 sps:$4 sm:$0xff]  }
  0xd6   : > { %3085 = vmatprep.subr.bf16.mxu0 %v4799_v21  ;;  %2683 = vmatmul.mubr.bf16.gmra.mrb[64].mxu1 %v5519_v42  ;;  %v4811_v21 = vld [vmem:[%s7088_s1 + $0x1f4] ss:$24 sps:$4 sm:$0xff]  }
  0xd7   : > { %2530 = vmatmul.mubr.bf16.gmra.mrb[16].mxu0 %v5911_v13  ;;  %2692 = vmatprep.mubr.bf16.mxu1 %v5523_v44  ;;  %v257_v13 = vld [vmem:[%s5257_s27 + $0x290] sm:$0xff] }
  0xd8   : > { %2539 = vmatprep.mubr.bf16.mxu0 %v5913_v26  ;;  %2780 = vmatpush1.bf16.msra.mxu1 %v4794_v38  ;;  %v5947_v38 = vpack.c.bf16 %v245_v23, %v239_v22  ;;  %v251_v26 = vld [vmem:[%s5257_s27 + $0x260] sm:$0xff]  ;;  %v4814_v22 = vld [vmem:[%s7088_s1 + $0x51c] ss:$24 sps:$4 sm:$0xff]  }
  0xd9   : > { %3086 = vmatpush1.bf16.msra.mxu0 %v4797_v39  ;;  %2781 = vmatprep.subr.bf16.mxu1 %v4802_v50  ;;  %v5949_v39 = vpack.c.bf16 %v258_v52, %v252_v51  ;;  %v4806_v50 = vld [vmem:[%s7088_s1 + $0x4e8] ss:$24 sps:$4 sm:$0xff]   ;;  %v4817_v23 = vld [vmem:[%s7088_s1 + $0x224] ss:$24 sps:$4 sm:$0xff]  }
  0xda   : > { %3087 = vmatprep.subr.bf16.mxu0 %v4805_v27  ;;  %7156 = vst [vmem:[#allocation18_spill] sm:$0xff] %v5947_v38  ;;  %v4809_v27 = vld [vmem:[%s7088_s1 + $0x1f0] ss:$24 sps:$4 sm:$0xff]   ;;  %v270_v52 = vld [vmem:[%s5257_s27 + $0x2f8] sm:$0xff] }
  0xdb   : > { %7157 = vst [vmem:[#allocation19_spill] sm:$0xff] %v5949_v39  ;;  %v264_v51 = vld [vmem:[%s5257_s27 + $0x2c8] sm:$0xff] }
  0xdc   : > { %2782 = vmatpush1.bf16.msra.mxu1 %v4800_v55  ;;  %v4812_v55 = vld [vmem:[%s7088_s1 + $0x518] ss:$24 sps:$4 sm:$0xff]  }
  0xdd   : > { %3088 = vmatpush1.bf16.msra.mxu0 %v4803_v63  ;;  %2783 = vmatprep.subr.bf16.mxu1 %v4808_v12  ;;  %v4815_v63 = vld [vmem:[%s7088_s1 + $0x220] ss:$24 sps:$4 sm:$0xff]   ;;  %v4820_v12 = vld [vmem:[%s7088_s1 + $0x54c] ss:$24 sps:$4 sm:$0xff]  }
  0xde   : > { %3089 = vmatprep.subr.bf16.mxu0 %v4811_v21  ;;  %2693 = vmatmul.mubr.bf16.gmra.mrb[68].mxu1 %v5563_v4  ;;  %v4823_v21 = vld [vmem:[%s7088_s1 + $0x254] ss:$24 sps:$4 sm:$0xff]  }
  0xdf   : > { %2540 = vmatmul.mubr.bf16.gmra.mrb[20].mxu0 %v5947_v38  ;;  %2702 = vmatprep.mubr.bf16.mxu1 %v5567_v6  ;;  %v269_v38 = vld [vmem:[%s5257_s27 + $0x2f0] sm:$0xff] }
  0xe0   : > { %2549 = vmatprep.mubr.bf16.mxu0 %v5949_v39  ;;  %2784 = vmatpush1.bf16.msra.mxu1 %v4806_v50  ;;  %v5983_v50 = vpack.c.bf16 %v257_v13, %v251_v26  ;;  %v263_v39 = vld [vmem:[%s5257_s27 + $0x2c0] sm:$0xff]  ;;  %v4826_v13 = vld [vmem:[%s7088_s1 + $0x57c] ss:$24 sps:$4 sm:$0xff]  }
  0xe1   : > { %3090 = vmatpush1.bf16.msra.mxu0 %v4809_v27  ;;  %2785 = vmatprep.subr.bf16.mxu1 %v4814_v22  ;;  %v5985_v27 = vpack.c.bf16 %v270_v52, %v264_v51  ;;  %v4818_v22 = vld [vmem:[%s7088_s1 + $0x548] ss:$24 sps:$4 sm:$0xff]   ;;  %v4829_v26 = vld [vmem:[%s7088_s1 + $0x284] ss:$24 sps:$4 sm:$0xff]  }
  0xe2   : > { %3091 = vmatprep.subr.bf16.mxu0 %v4817_v23  ;;  %7158 = vst [vmem:[#allocation20_spill] sm:$0xff] %v5983_v50  ;;  %v4821_v23 = vld [vmem:[%s7088_s1 + $0x250] ss:$24 sps:$4 sm:$0xff]   ;;  %v282_v52 = vld [vmem:[%s5257_s27 + $0x358] sm:$0xff] }
  0xe3   : > { %7159 = vst [vmem:[#allocation21_spill] sm:$0xff] %v5985_v27  ;;  %v276_v51 = vld [vmem:[%s5257_s27 + $0x328] sm:$0xff] }
  0xe4   : > { %2786 = vmatpush1.bf16.msra.mxu1 %v4812_v55  ;;  %v4824_v55 = vld [vmem:[%s7088_s1 + $0x578] ss:$24 sps:$4 sm:$0xff]  }
  0xe5   : > { %3092 = vmatpush1.bf16.msra.mxu0 %v4815_v63  ;;  %2787 = vmatprep.subr.bf16.mxu1 %v4820_v12  ;;  %v4827_v63 = vld [vmem:[%s7088_s1 + $0x280] ss:$24 sps:$4 sm:$0xff]   ;;  %v4832_v12 = vld [vmem:[%s7088_s1 + $0x5ac] ss:$24 sps:$4 sm:$0xff]  }
  0xe6   : > { %3093 = vmatprep.subr.bf16.mxu0 %v4823_v21  ;;  %2703 = vmatmul.mubr.bf16.gmra.mrb[72].mxu1 %v5607_v32  ;;  %v4835_v21 = vld [vmem:[%s7088_s1 + $0x2b4] ss:$24 sps:$4 sm:$0xff]  }
  0xe7   : > { %2550 = vmatmul.mubr.bf16.gmra.mrb[24].mxu0 %v5983_v50  ;;  %2712 = vmatprep.mubr.bf16.mxu1 %v5611_v34  ;;  %v6021_v50 = vpack.c.bf16 %v282_v52, %v276_v51  ;;  %v294_v51 = vld [vmem:[%s5257_s27 + $0x3b8] sm:$0xff] }
  0xe8   : > { %2559 = vmatprep.mubr.bf16.mxu0 %v5985_v27  ;;  %2788 = vmatpush1.bf16.msra.mxu1 %v4818_v22  ;;  %v6019_v27 = vpack.c.bf16 %v269_v38, %v263_v39  ;;  %v4830_v22 = vld [vmem:[%s7088_s1 + $0x5a8] ss:$24 sps:$4 sm:$0xff]   ;;  %v4841_v38 = vld [vmem:[%s7088_s1 + $0x2e4] ss:$24 sps:$4 sm:$0xff]   ;;  %v4836_v52 = vld [vmem:[%s7088_s1 + $0x5d8] ss:$24 sps:$4 sm:$0xff]  }
  0xe9   : > { %3094 = vmatpush1.bf16.msra.mxu0 %v4821_v23  ;;  %2789 = vmatprep.subr.bf16.mxu1 %v4826_v13  ;;  %7161 = vst [vmem:[#allocation23_spill] sm:$0xff] %v6021_v50  ;;  %v4833_v23 = vld [vmem:[%s7088_s1 + $0x2b0] ss:$24 sps:$4 sm:$0xff]   ;;  %v275_v39 = vld [vmem:[%s5257_s27 + $0x320] sm:$0xff] }
  0xea   : > { %3095 = vmatprep.subr.bf16.mxu0 %v4829_v26  ;;  %7160 = vst [vmem:[#allocation22_spill] sm:$0xff] %v6019_v27  ;;  %v281_v13 = vld [vmem:[%s5257_s27 + $0x350] sm:$0xff]  ;;  %v288_v26 = vld [vmem:[%s5257_s27 + $0x388] sm:$0xff] }
  0xec   : > { %2790 = vmatpush1.bf16.msra.mxu1 %v4824_v55  ;;  %v4839_v55 = vld [vmem:[%s7088_s1 + $0x2e0] ss:$24 sps:$4 sm:$0xff]  }
  0xed   : > { %3096 = vmatpush1.bf16.msra.mxu0 %v4827_v63  ;;  %2791 = vmatprep.subr.bf16.mxu1 %v4832_v12  ;;  %v4844_v63 = vld [vmem:[%s7088_s1 + $0x60c] ss:$24 sps:$4 sm:$0xff]  }
  0xee   : > { %3097 = vmatprep.subr.bf16.mxu0 %v4835_v21  ;;  %2713 = vmatmul.mubr.bf16.gmra.mrb[76].mxu1 %v5651_v2  ;;  %v4847_v12 = vld [vmem:[%s7088_s1 + $0x314] ss:$24 sps:$4 sm:$0xff]   ;;  %v6055_v21 = vpack.c.bf16 %v281_v13, %v275_v39  ;;  %v299_v39 = vld [vmem:[%s5257_s27 + $0x3e0] sm:$0xff] }
  0xef   : > { %2560 = vmatmul.mubr.bf16.gmra.mrb[28].mxu0 %v6019_v27  ;;  %2722 = vmatprep.mubr.bf16.mxu1 %v5655_v8  ;;  %v6057_v27 = vpack.c.bf16 %v294_v51, %v288_v26  ;;  %v305_v13 = vld [vmem:[%s5257_s27 + $0x410] sm:$0xff]  ;;  %v312_v26 = vld [vmem:[%s5257_s27 + $0x448] sm:$0xff]  ;;  %v318_v51 = vld [vmem:[%s5257_s27 + $0x478] sm:$0xff] }
  0xf0   : > { %2569 = vmatprep.mubr.bf16.mxu0 %v6021_v50  ;;  %2792 = vmatpush1.bf16.msra.mxu1 %v4830_v22  ;;  %v287_v50 = vld [vmem:[%s5257_s27 + $0x380] sm:$0xff]  ;;  %v306_v22 = vld [vmem:[%s5257_s27 + $0x418] sm:$0xff] }
  0xf1   : > { %3098 = vmatpush1.bf16.msra.mxu0 %v4833_v23  ;;  %2793 = vmatprep.subr.bf16.mxu1 %v4838_v20  ;;  %v300_v20 = vld [vmem:[%s5257_s27 + $0x3e8] sm:$0xff]  ;;  %v6067_v23 = vpack.c.bf16 %v293_v62, %v287_v50  ;;  %v6081_v62 = vpack.c.bf16 %v318_v51, %v312_v26  ;;  %v311_v50 = vld [vmem:[%s5257_s27 + $0x440] sm:$0xff] }
  0xf2   : > { %3099 = vmatprep.subr.bf16.mxu0 %v4841_v38  ;;  %v6069_v38 = vpack.c.bf16 %v306_v22, %v300_v20  ;;  %v4845_v20 = vld [vmem:[%s7088_s1 + $0x310] ss:$24 sps:$4 sm:$0xff]   ;;  %v4850_v22 = vld [vmem:[%s7088_s1 + $0x63c] ss:$24 sps:$4 sm:$0xff]   ;;  %v4856_v26 = vld [vmem:[%s7088_s1 + $0x66c] ss:$24 sps:$4 sm:$0xff]  }
  0xf3   : > { %7162 = vst [vmem:[#allocation24_spill] sm:$0xff] %v6067_v23  ;;  %7165 = vst [vmem:[#allocation27_spill] sm:$0xff] %v6081_v62  ;;  %v4854_v51 = vld [vmem:[%s7088_s1 + $0x668] ss:$24 sps:$4 sm:$0xff]  }
  0xf4   : > { %2794 = vmatpush1.bf16.msra.mxu1 %v4836_v52  ;;  %7163 = vst [vmem:[#allocation25_spill] sm:$0xff] %v6069_v38  ;;  %v6079_v52 = vpack.c.bf16 %v305_v13, %v299_v39  ;;  %v4853_v39 = vld [vmem:[%s7088_s1 + $0x344] ss:$24 sps:$4 sm:$0xff]   ;;  %v4851_v13 = vld [vmem:[%s7088_s1 + $0x340] ss:$24 sps:$4 sm:$0xff]  }
  0xf5   : > { %3100 = vmatpush1.bf16.msra.mxu0 %v4839_v55  ;;  %2916 = vmatprep.subr.bf16.mxu1 %v4844_v63  ;;  %v317_v55 = vld [vmem:[%s5257_s27 + $0x470] sm:$0xff]  ;;  %s4986_s27 = scalar_lea.vmem %s7035_s19, 18432 }
  0xf6   : > { %3222 = vmatprep.subr.bf16.mxu0 %v4847_v12  ;;  %2723 = vmatmul.mubr.bf16.gmra.mrb[80].mxu1 %v5695_v46  ;;  %7164 = vst [vmem:[#allocation26_spill] sm:$0xff] %v6079_v52  ;;  %v6089_v63 = vpack.c.bf16 %v317_v55, %v311_v50  ;;  %v4842_v12 = vld [vmem:[%s7088_s1 + $0x608] ss:$24 sps:$4 sm:$0xff]   ;;  %v4862_v55 = vld [vmem:[%s7088_s1 + $0x69c] ss:$24 sps:$4 sm:$0xff]   ;;  %p4987_p11 = scmp.ne.s32.totalorder %s7035_s19, %s4986_s27  ;;  %p4994_p1 = scmp.lt.s32.totalorder %s4992_s29, %s4986_s27 }
  0xf7   : > { %2570 = vmatmul.mubr.bf16.gmra.mrb[32].mxu0 %v6055_v21  ;;  %2732 = vmatprep.mubr.bf16.mxu1 %v5699_v48  ;;  %v4857_v50 = vld [vmem:[%s7088_s1 + $0x370] ss:$24 sps:$4 sm:$0xff]  }
  0xf8   : > { %2579 = vmatprep.mubr.bf16.mxu0 %v6057_v27  ;;  %7166 = vst [vmem:[#allocation28_spill] sm:$0xff] %v6089_v63  ;;  %p4988_p12 = pnand %p4987_p11, %p5111_p5  ;;  %p4995_p2 = por %p4994_p1, %p4993_p0 }
  0xfa   : > { %p4989_p13 = pneg %p4988_p12 }
  0xfc   : > { %p4996_p3 = pnand %p4995_p2, %p4989_p13 }
  0xfe   : > { %2733 = vmatmul.mubr.bf16.gmra.mrb[84].mxu1 %v5715_v0 }
  0xff   : > { %2580 = vmatmul.mubr.bf16.gmra.mrb[36].mxu0 %v6067_v23  ;;  %2742 = vmatprep.mubr.bf16.mxu1 %v5719_v10 }
 0x100   : > { %2589 = vmatprep.mubr.bf16.mxu0 %v6069_v38  ;;  %v4937_v38 = vld [vmem:[%s7088_s1 + $0x5e4] ss:$24 sps:$4 sm:$0xff]  }
 0x106   : > { %2743 = vmatmul.mubr.bf16.gmra.mrb[88].mxu1 %v5735_v28 }
 0x107   : > { %2590 = vmatmul.mubr.bf16.gmra.mrb[40].mxu0 %v6079_v52  ;;  %2752 = vmatprep.mubr.bf16.mxu1 %v5739_v30  ;;  %v4934_v52 = vld [vmem:[%s7088_s1 + $0x8dc] ss:$24 sps:$4 sm:$0xff]  }
 0x108   : > { %2599 = vmatprep.mubr.bf16.mxu0 %v6081_v62  ;;  %v4925_v62 = vld [vmem:[%s7088_s1 + $0x584] ss:$24 sps:$4 sm:$0xff]  }
 0x10e   : > { %2753 = vmatmul.mubr.bf16.gmra.mrb[92].mxu1 %v5753_v56 }
 0x10f   : > { %2600 = vmatmul.mubr.bf16.gmra.mrb[44].mxu0 %v6089_v63  ;;  %2795 = vmatprep.mubr.bf16.mxu1 %v5280_v54  ;;  %v4922_v63 = vld [vmem:[%s7088_s1 + $0x87c] ss:$24 sps:$4 sm:$0xff]  }
 0x110   : > { %3101 = vmatprep.mubr.bf16.mxu0 %v5278_v53  ;;  %v4848_v53 = vld [vmem:[%s7088_s1 + $0x638] ss:$24 sps:$4 sm:$0xff]  }
 0x116   : > { %2796 = vmatmul.mubr.bf16.vlgmr.msra.gmra.mrb[48].mxu1 %v5348_v16 }
 0x117   : > { %3102 = vmatmul.mubr.bf16.vlgmr.msra.gmra.mrb[48].mxu0 %v5346_v15  ;;  %2917 = vmatpush1.bf16.msra.mxu1 %v4842_v12  ;;  %v4859_v15 = vld [vmem:[%s7088_s1 + $0x374] ss:$24 sps:$4 sm:$0xff]   ;;  %v4860_v12 = vld [vmem:[%s7088_s1 + $0x698] ss:$24 sps:$4 sm:$0xff]  }
 0x118   : > { %3223 = vmatpush1.bf16.msra.mxu0 %v4845_v20  ;;  %2918 = vmatprep.subr.bf16.mxu1 %v4850_v22  ;;  %v4863_v20 = vld [vmem:[%s7088_s1 + $0x3a0] ss:$24 sps:$4 sm:$0xff]   ;;  %v4868_v22 = vld [vmem:[%s7088_s1 + $0x6cc] ss:$24 sps:$4 sm:$0xff]  }
 0x119   : > { %3224 = vmatprep.subr.bf16.mxu0 %v4853_v39  ;;  %2805 = vmatprep.mubr.bf16.mxu1 %v5367_v25  ;;  %v4866_v39 = vld [vmem:[%s7088_s1 + $0x6c8] ss:$24 sps:$4 sm:$0xff]  }
 0x11a   : > { %3111 = vmatprep.mubr.bf16.mxu0 %v5365_v24  ;;  %v4865_v24 = vld [vmem:[%s7088_s1 + $0x3a4] ss:$24 sps:$4 sm:$0xff]  }
 0x11b   : > { %2919 = vmatpush1.bf16.msra.mxu1 %v4848_v53  ;;  %v4874_v53 = vld [vmem:[%s7088_s1 + $0x6fc] ss:$24 sps:$4 sm:$0xff]  }
 0x11c   : > { %3225 = vmatpush1.bf16.msra.mxu0 %v4851_v13  ;;  %2920 = vmatprep.subr.bf16.mxu1 %v4856_v26  ;;  %v4877_v13 = vld [vmem:[%s7088_s1 + $0x404] ss:$24 sps:$4 sm:$0xff]   ;;  %v4872_v26 = vld [vmem:[%s7088_s1 + $0x6f8] ss:$24 sps:$4 sm:$0xff]  }
 0x11d   : > { %3226 = vmatprep.subr.bf16.mxu0 %v4859_v15  ;;  %v4875_v15 = vld [vmem:[%s7088_s1 + $0x400] ss:$24 sps:$4 sm:$0xff]  }
 0x11e   : > { %2806 = vmatmul.mubr.bf16.gmra.mrb[52].mxu1 %v5389_v37 }
 0x11f   : > { %3112 = vmatmul.mubr.bf16.gmra.mrb[52].mxu0 %v5387_v36  ;;  %2921 = vmatpush1.bf16.msra.mxu1 %v4854_v51  ;;  %v4871_v36 = vld [vmem:[%s7088_s1 + $0x3d4] ss:$24 sps:$4 sm:$0xff]  }
 0x120   : > { %3227 = vmatpush1.bf16.msra.mxu0 %v4857_v50  ;;  %2815 = vmatprep.mubr.bf16.mxu1 %v5399_v41 }
 0x121   : > { %3121 = vmatprep.mubr.bf16.mxu0 %v5397_v40  ;;  %2922 = vmatprep.subr.bf16.mxu1 %v4862_v55  ;;  %v4869_v40 = vld [vmem:[%s7088_s1 + $0x3d0] ss:$24 sps:$4 sm:$0xff]  }
 0x122   : > { %3228 = vmatprep.subr.bf16.mxu0 %v4865_v24 }
 0x123   : > { %2923 = vmatpush1.bf16.msra.mxu1 %v4860_v12  ;;  %v4878_v12 = vld [vmem:[%s7088_s1 + $0x728] ss:$24 sps:$4 sm:$0xff]  }
 0x124   : > { %3229 = vmatpush1.bf16.msra.mxu0 %v4863_v20  ;;  %2924 = vmatprep.subr.bf16.mxu1 %v4868_v22  ;;  %v4881_v20 = vld [vmem:[%s7088_s1 + $0x430] ss:$24 sps:$4 sm:$0xff]   ;;  %v4886_v22 = vld [vmem:[%s7088_s1 + $0x75c] ss:$24 sps:$4 sm:$0xff]  }
 0x125   : > { %3230 = vmatprep.subr.bf16.mxu0 %v4871_v36  ;;  %v4889_v36 = vld [vmem:[%s7088_s1 + $0x464] ss:$24 sps:$4 sm:$0xff]  }
 0x126   : > { %2816 = vmatmul.mubr.bf16.gmra.mrb[56].mxu1 %v5433_v59 }
 0x127   : > { %3122 = vmatmul.mubr.bf16.gmra.mrb[56].mxu0 %v5431_v58  ;;  %2825 = vmatprep.mubr.bf16.mxu1 %v5437_v61  ;;  %v4880_v58 = vld [vmem:[%s7088_s1 + $0x72c] ss:$24 sps:$4 sm:$0xff]  }
 0x128   : > { %3131 = vmatprep.mubr.bf16.mxu0 %v5435_v60  ;;  %2925 = vmatpush1.bf16.msra.mxu1 %v4866_v39  ;;  %v4883_v60 = vld [vmem:[%s7088_s1 + $0x434] ss:$24 sps:$4 sm:$0xff]   ;;  %v4884_v39 = vld [vmem:[%s7088_s1 + $0x758] ss:$24 sps:$4 sm:$0xff]  }
 0x129   : > { %3231 = vmatpush1.bf16.msra.mxu0 %v4869_v40  ;;  %v6173_v51 = vpop.f32.mrb[0].mxu1  ;;  %2926 = vmatprep.subr.bf16.mxu1 %v4874_v53  ;;  %v4887_v40 = vld [vmem:[%s7088_s1 + $0x460] ss:$24 sps:$4 sm:$0xff]  }
 0x12a   : > { %3232 = vmatprep.subr.bf16.mxu0 %v4877_v13  ;;  %v6181_v50 = vpop.f32.mrb[1].mxu1 }
 0x12b   : > { %v6183_v55 = vpop.f32.mrb[2].mxu1 }
 0x12c   : > { %v6185_v24 = vpop.f32.mrb[3].mxu1  ;;  %2927 = vmatpush1.bf16.msra.mxu1 %v4872_v26 }
 0x12d   : > { %3233 = vmatpush1.bf16.msra.mxu0 %v4875_v15  ;;  %2928 = vmatprep.subr.bf16.mxu1 %v4880_v58  ;;  %v4890_v58 = vld [vmem:[%s7088_s1 + $0x788] ss:$24 sps:$4 sm:$0xff]  }
 0x12e   : > { %3234 = vmatprep.subr.bf16.mxu0 %v4883_v60  ;;  %2826 = vmatmul.mubr.bf16.gmra.mrb[60].mxu1 %v5477_v17  ;;  %v4893_v60 = vld [vmem:[%s7088_s1 + $0x490] ss:$24 sps:$4 sm:$0xff]  }
 0x12f   : > { %3132 = vmatmul.mubr.bf16.gmra.mrb[60].mxu0 %v5475_v14  ;;  %2835 = vmatprep.mubr.bf16.mxu1 %v5481_v19  ;;  %v4892_v14 = vld [vmem:[%s7088_s1 + $0x78c] ss:$24 sps:$4 sm:$0xff]  }
 0x130   : > { %3141 = vmatprep.mubr.bf16.mxu0 %v5479_v18  ;;  %2929 = vmatpush1.bf16.msra.mxu1 %v4878_v12  ;;  %v4895_v18 = vld [vmem:[%s7088_s1 + $0x494] ss:$24 sps:$4 sm:$0xff]  }
 0x131   : > { %3235 = vmatpush1.bf16.msra.mxu0 %v4881_v20  ;;  %v6209_v53 = vpop.f32.mrb[4].mxu1  ;;  %2930 = vmatprep.subr.bf16.mxu1 %v4886_v22  ;;  %v4898_v12 = vld [vmem:[%s7088_s1 + $0x7bc] ss:$24 sps:$4 sm:$0xff]   ;;  %v4896_v22 = vld [vmem:[%s7088_s1 + $0x7b8] ss:$24 sps:$4 sm:$0xff]  }
 0x132   : > { %3236 = vmatprep.subr.bf16.mxu0 %v4889_v36  ;;  %v6217_v13 = vpop.f32.mrb[5].mxu1  ;;  %v4901_v20 = vld [vmem:[%s7088_s1 + $0x4c4] ss:$24 sps:$4 sm:$0xff]   ;;  %v4899_v36 = vld [vmem:[%s7088_s1 + $0x4c0] ss:$24 sps:$4 sm:$0xff]  }
 0x133   : > { %v6219_v26 = vpop.f32.mrb[6].mxu1 }
 0x134   : > { %v6221_v15 = vpop.f32.mrb[7].mxu1  ;;  %2931 = vmatpush1.bf16.msra.mxu1 %v4884_v39 }
 0x135   : > { %3237 = vmatpush1.bf16.msra.mxu0 %v4887_v40  ;;  %2932 = vmatprep.subr.bf16.mxu1 %v4892_v14 }
 0x136   : > { %3238 = vmatprep.subr.bf16.mxu0 %v4895_v18  ;;  %2836 = vmatmul.mubr.bf16.gmra.mrb[64].mxu1 %v5521_v43 }
 0x137   : > { %3142 = vmatmul.mubr.bf16.gmra.mrb[64].mxu0 %v5519_v42  ;;  %2845 = vmatprep.mubr.bf16.mxu1 %v5525_v45  ;;  %v4904_v42 = vld [vmem:[%s7088_s1 + $0x7ec] ss:$24 sps:$4 sm:$0xff]  }
 0x138   : > { %3151 = vmatprep.mubr.bf16.mxu0 %v5523_v44  ;;  %2933 = vmatpush1.bf16.msra.mxu1 %v4890_v58  ;;  %v4907_v44 = vld [vmem:[%s7088_s1 + $0x4f4] ss:$24 sps:$4 sm:$0xff]   ;;  %v4902_v58 = vld [vmem:[%s7088_s1 + $0x7e8] ss:$24 sps:$4 sm:$0xff]  }
 0x139   : > { %3239 = vmatpush1.bf16.msra.mxu0 %v4893_v60  ;;  %v6245_v39 = vpop.f32.mrb[8].mxu1  ;;  %2934 = vmatprep.subr.bf16.mxu1 %v4898_v12  ;;  %v4905_v60 = vld [vmem:[%s7088_s1 + $0x4f0] ss:$24 sps:$4 sm:$0xff]   ;;  %v4910_v12 = vld [vmem:[%s7088_s1 + $0x81c] ss:$24 sps:$4 sm:$0xff]  }
 0x13a   : > { %3240 = vmatprep.subr.bf16.mxu0 %v4901_v20  ;;  %v6253_v40 = vpop.f32.mrb[9].mxu1  ;;  %v4913_v20 = vld [vmem:[%s7088_s1 + $0x524] ss:$24 sps:$4 sm:$0xff]  }
 0x13b   : > { %v6255_v14 = vpop.f32.mrb[10].mxu1 }
 0x13c   : > { %v6257_v18 = vpop.f32.mrb[11].mxu1  ;;  %2935 = vmatpush1.bf16.msra.mxu1 %v4896_v22  ;;  %v4908_v22 = vld [vmem:[%s7088_s1 + $0x818] ss:$24 sps:$4 sm:$0xff]  }
 0x13d   : > { %3241 = vmatpush1.bf16.msra.mxu0 %v4899_v36  ;;  %2936 = vmatprep.subr.bf16.mxu1 %v4904_v42  ;;  %v4911_v36 = vld [vmem:[%s7088_s1 + $0x520] ss:$24 sps:$4 sm:$0xff]  }
 0x13e   : > { %3242 = vmatprep.subr.bf16.mxu0 %v4907_v44  ;;  %2846 = vmatmul.mubr.bf16.gmra.mrb[68].mxu1 %v5565_v5 }
 0x13f   : > { %3152 = vmatmul.mubr.bf16.gmra.mrb[68].mxu0 %v5563_v4  ;;  %2855 = vmatprep.mubr.bf16.mxu1 %v5569_v7  ;;  %v4916_v4 = vld [vmem:[%s7088_s1 + $0x84c] ss:$24 sps:$4 sm:$0xff]  }
 0x140   : > { %3161 = vmatprep.mubr.bf16.mxu0 %v5567_v6  ;;  %2937 = vmatpush1.bf16.msra.mxu1 %v4902_v58  ;;  %v4919_v6 = vld [vmem:[%s7088_s1 + $0x554] ss:$24 sps:$4 sm:$0xff]  }
 0x141   : > { %3243 = vmatpush1.bf16.msra.mxu0 %v4905_v60  ;;  %v6281_v42 = vpop.f32.mrb[12].mxu1  ;;  %2938 = vmatprep.subr.bf16.mxu1 %v4910_v12  ;;  %v4914_v12 = vld [vmem:[%s7088_s1 + $0x848] ss:$24 sps:$4 sm:$0xff]  }
 0x142   : > { %3244 = vmatprep.subr.bf16.mxu0 %v4913_v20  ;;  %v6289_v44 = vpop.f32.mrb[13].mxu1  ;;  %v4917_v20 = vld [vmem:[%s7088_s1 + $0x550] ss:$24 sps:$4 sm:$0xff]  }
 0x143   : > { %v6291_v58 = vpop.f32.mrb[14].mxu1 }
 0x144   : > { %v6293_v60 = vpop.f32.mrb[15].mxu1  ;;  %2939 = vmatpush1.bf16.msra.mxu1 %v4908_v22  ;;  %v4920_v22 = vld [vmem:[%s7088_s1 + $0x878] ss:$24 sps:$4 sm:$0xff]  }
 0x145   : > { %3245 = vmatpush1.bf16.msra.mxu0 %v4911_v36  ;;  %2940 = vmatprep.subr.bf16.mxu1 %v4916_v4  ;;  %v4923_v36 = vld [vmem:[%s7088_s1 + $0x580] ss:$24 sps:$4 sm:$0xff]  }
 0x146   : > { %3246 = vmatprep.subr.bf16.mxu0 %v4919_v6  ;;  %2856 = vmatmul.mubr.bf16.gmra.mrb[72].mxu1 %v5609_v33 }
 0x147   : > { %3162 = vmatmul.mubr.bf16.gmra.mrb[72].mxu0 %v5607_v32  ;;  %2865 = vmatprep.mubr.bf16.mxu1 %v5613_v35  ;;  %v4928_v32 = vld [vmem:[%s7088_s1 + $0x8ac] ss:$24 sps:$4 sm:$0xff]  }
 0x148   : > { %3171 = vmatprep.mubr.bf16.mxu0 %v5611_v34  ;;  %2941 = vmatpush1.bf16.msra.mxu1 %v4914_v12  ;;  %v4931_v34 = vld [vmem:[%s7088_s1 + $0x5b4] ss:$24 sps:$4 sm:$0xff]  }
 0x149   : > { %3247 = vmatpush1.bf16.msra.mxu0 %v4917_v20  ;;  %v6317_v4 = vpop.f32.mrb[16].mxu1  ;;  %2942 = vmatprep.subr.bf16.mxu1 %v4922_v63  ;;  %v4929_v63 = vld [vmem:[%s7088_s1 + $0x5b0] ss:$24 sps:$4 sm:$0xff]  }
 0x14a   : > { %3248 = vmatprep.subr.bf16.mxu0 %v4925_v62  ;;  %v6325_v6 = vpop.f32.mrb[17].mxu1  ;;  %v4926_v62 = vld [vmem:[%s7088_s1 + $0x8a8] ss:$24 sps:$4 sm:$0xff]  }
 0x14b   : > { %v6327_v12 = vpop.f32.mrb[18].mxu1 }
 0x14c   : > { %v6329_v20 = vpop.f32.mrb[19].mxu1  ;;  %2943 = vmatpush1.bf16.msra.mxu1 %v4920_v22  ;;  %v4932_v22 = vld [vmem:[%s7088_s1 + $0x8d8] ss:$24 sps:$4 sm:$0xff]  }
 0x14d   : > { %3249 = vmatpush1.bf16.msra.mxu0 %v4923_v36  ;;  %2944 = vmatprep.subr.bf16.mxu1 %v4928_v32  ;;  %v4935_v36 = vld [vmem:[%s7088_s1 + $0x5e0] ss:$24 sps:$4 sm:$0xff]  }
 0x14e   : > { %3250 = vmatprep.subr.bf16.mxu0 %v4931_v34  ;;  %2866 = vmatmul.mubr.bf16.gmra.mrb[76].mxu1 %v5653_v3 }
 0x14f   : > { %3172 = vmatmul.mubr.bf16.gmra.mrb[76].mxu0 %v5651_v2  ;;  %2875 = vmatprep.mubr.bf16.mxu1 %v5657_v9  ;;  %v4940_v2 = vld [vmem:[%s7088_s1 + $0x614] ss:$24 sps:$4 sm:$0xff]  }
 0x150   : > { %3181 = vmatprep.mubr.bf16.mxu0 %v5655_v8  ;;  %2945 = vmatpush1.bf16.msra.mxu1 %v4926_v62 }
 0x151   : > { %3251 = vmatpush1.bf16.msra.mxu0 %v4929_v63  ;;  %v6353_v32 = vpop.f32.mrb[20].mxu1  ;;  %2946 = vmatprep.subr.bf16.mxu1 %v4934_v52 }
 0x152   : > { %3252 = vmatprep.subr.bf16.mxu0 %v4937_v38  ;;  %v6358_v34 = vpop.f32.mrb[21].mxu1 }
 0x153   : > { %v6360_v8 = vpop.f32.mrb[22].mxu1 }
 0x154   : > { %v6362_v62 = vpop.f32.mrb[23].mxu1  ;;  %2947 = vmatpush1.bf16.msra.mxu1 %v4932_v22 }
 0x155   : > { %3253 = vmatpush1.bf16.msra.mxu0 %v4935_v36  ;;  %4045 = vmatprep.subr.bf16.mxu1 %v4940_v2 }
 0x156   : > { %3375 = vmatprep.subr.bf16.mxu0 %v4940_v2  ;;  %2876 = vmatmul.mubr.bf16.gmra.mrb[80].mxu1 %v5697_v47 }
 0x157   : > { %3182 = vmatmul.mubr.bf16.gmra.mrb[80].mxu0 %v5695_v46  ;;  %2885 = vmatprep.mubr.bf16.mxu1 %v5701_v49 }
 0x158   : > { %3191 = vmatprep.mubr.bf16.mxu0 %v5699_v48 }
 0x159   : > { %v6368_v38 = vpop.f32.mrb[24].mxu1 }
 0x15a   : > { %v6370_v52 = vpop.f32.mrb[25].mxu1 }
 0x15b   : > { %v6372_v63 = vpop.f32.mrb[26].mxu1 }
 0x15c   : > { %v6374_v23 = vpop.f32.mrb[27].mxu1 }
 0x15e   : > { %2886 = vmatmul.mubr.bf16.gmra.mrb[84].mxu1 %v5717_v1 }
 0x15f   : > { %3192 = vmatmul.mubr.bf16.gmra.mrb[84].mxu0 %v5715_v0  ;;  %2895 = vmatprep.mubr.bf16.mxu1 %v5721_v11 }
 0x160   : > { %3201 = vmatprep.mubr.bf16.mxu0 %v5719_v10 }
 0x161   : > { %v6380_v46 = vpop.f32.mrb[28].mxu1 }
 0x162   : > { %7167 = vst [vmem:[#allocation29_spill] sm:$0xff] %v6380_v46  ;;  %v6382_v22 = vpop.f32.mrb[29].mxu1 }
 0x163   : > { %v6384_v48 = vpop.f32.mrb[30].mxu1 }
 0x164   : > { %v6386_v36 = vpop.f32.mrb[31].mxu1 }
 0x165   : > { %7168 = vst [vmem:[#allocation30_spill] sm:$0xff] %v6386_v36  ;;  %v7171_v36 = vld [vmem:[#allocation7_spill] sm:$0xff] }
 0x166   : > { %2896 = vmatmul.mubr.bf16.gmra.mrb[88].mxu1 %v5737_v29 }
 0x167   : > { %3202 = vmatmul.mubr.bf16.gmra.mrb[88].mxu0 %v5735_v28  ;;  %2905 = vmatprep.mubr.bf16.mxu1 %v5741_v31 }
 0x168   : > { %3211 = vmatprep.mubr.bf16.mxu0 %v5739_v30 }
 0x169   : > { %v6392_v0 = vpop.f32.mrb[32].mxu1 }
 0x16a   : > { %v6394_v2 = vpop.f32.mrb[33].mxu1 }
 0x16b   : > { %7169 = vst [vmem:[#allocation31_spill] sm:$0xff] %v6394_v2  ;;  %v6396_v10 = vpop.f32.mrb[34].mxu1 }
 0x16c   : > { %7170 = vst [vmem:[#allocation32_spill] sm:$0xff] %v6396_v10  ;;  %v6398_v46 = vpop.f32.mrb[35].mxu1  ;;  %v4938_v10 = vld [vmem:[%s7088_s1 + $0x610] ss:$24 sps:$4 sm:$0xff]  }
 0x16e   : > { %2906 = vmatmul.mubr.bf16.gmra.mrb[92].mxu1 %v5755_v57  ;;  %v7176_v57 = vld [vmem:[#allocation8_spill] sm:$0xff] }
 0x16f   : > { %3212 = vmatmul.mubr.bf16.gmra.mrb[92].mxu0 %v5753_v56  ;;  %2948 = vmatprep.mubr.bf16.mxu1 %v7171_v36  ;;  %v4943_v56 = vld [vmem:[%s7088_s1 + $0x644] ss:$24 sps:$4 sm:$0xff]  }
 0x170   : > { %3254 = vmatprep.mubr.bf16.mxu0 %v5280_v54  ;;  %v4941_v54 = vld [vmem:[%s7088_s1 + $0x640] ss:$24 sps:$4 sm:$0xff]  }
 0x171   : > { %v6404_v28 = vpop.f32.mrb[36].mxu1 }
 0x172   : > { %7172 = vst [vmem:[#allocation33_spill] sm:$0xff] %v6404_v28  ;;  %v6406_v31 = vpop.f32.mrb[37].mxu1  ;;  %v7178_v28 = vld [vmem:[#allocation9_spill] sm:$0xff] }
 0x173   : > { %7173 = vst [vmem:[#allocation34_spill] sm:$0xff] %v6406_v31  ;;  %v6408_v30 = vpop.f32.mrb[38].mxu1 }
 0x174   : > { %7174 = vst [vmem:[#allocation35_spill] sm:$0xff] %v6408_v30  ;;  %v6413_v2 = vpop.f32.mrb[39].mxu1  ;;  %v681_v30 = vlaneseq }
 0x175   : > { %7175 = vst [vmem:[#allocation36_spill] sm:$0xff] %v6413_v2  ;;  %v4946_v2 = vld [vmem:[%s7088_s1 + $0x674] ss:$24 sps:$4 sm:$0xff]  }
 0x176   : > { %2949 = vmatmul.mubr.bf16.vlgmr.msra.gmra.mrb[48].mxu1 %v7176_v57  ;;  %v6437_v57 = vshrl.u32 %v681_v30, 7  ;;  %v4947_v30 = vld [vmem:[%s7088_s1 + $0x6a0] ss:$24 sps:$4 sm:$0xff]  }
 0x177   : > { %3255 = vmatmul.mubr.bf16.vlgmr.msra.gmra.mrb[48].mxu0 %v5348_v16  ;;  %4061 = vmatpush1.bf16.msra.mxu1 %v4938_v10 }
 0x178   : > { %3376 = vmatpush1.bf16.msra.mxu0 %v4938_v10  ;;  %4046 = vmatprep.subr.bf16.mxu1 %v4943_v56  ;;  %7181 = vst [vmem:[#allocation39_spill] sm:$0xff] %v6437_v57 }
 0x179   : > { %3377 = vmatprep.subr.bf16.mxu0 %v4943_v56  ;;  %v6426_v31 = vpop.f32.mrb[40].mxu1  ;;  %2958 = vmatprep.mubr.bf16.mxu1 %v7178_v28  ;;  %v4944_v56 = vld [vmem:[%s7088_s1 + $0x670] ss:$24 sps:$4 sm:$0xff]  }
 0x17a   : > { %7177 = vst [vmem:[#allocation37_spill] sm:$0xff] %v6426_v31  ;;  %3264 = vmatprep.mubr.bf16.mxu0 %v5367_v25  ;;  %v6430_v16 = vpop.f32.mrb[41].mxu1  ;;  %v4949_v25 = vld [vmem:[%s7088_s1 + $0x6a4] ss:$24 sps:$4 sm:$0xff]   ;;  %v7183_v31 = vld [vmem:[#allocation10_spill] sm:$0xff] }
 0x17b   : > { %7179 = vst [vmem:[#allocation9_spill] sm:$0xff] %v6430_v16  ;;  %v6432_v10 = vpop.f32.mrb[42].mxu1  ;;  %4062 = vmatpush1.bf16.msra.mxu1 %v4941_v54 }
 0x17c   : > { %7180 = vst [vmem:[#allocation38_spill] sm:$0xff] %v6432_v10  ;;  %3378 = vmatpush1.bf16.msra.mxu0 %v4941_v54  ;;  %v6439_v36 = vpop.f32.mrb[43].mxu1  ;;  %4047 = vmatprep.subr.bf16.mxu1 %v4946_v2  ;;  %v683_v54 = vsub.s32 0, %v6437_v57 }
 0x17d   : > { %7182 = vst [vmem:[#allocation40_spill] sm:$0xff] %v6439_v36  ;;  %3379 = vmatprep.subr.bf16.mxu0 %v4946_v2  ;;  %v7184_v36 = vld [vmem:[#allocation11_spill] sm:$0xff] }
 0x17e   : > { %2959 = vmatmul.mubr.bf16.gmra.mrb[52].mxu1 %v7183_v31  ;;  %v4952_v2 = vld [vmem:[%s7088_s1 + $0x6d4] ss:$24 sps:$4 sm:$0xff]  }
 0x17f   : > { %3265 = vmatmul.mubr.bf16.gmra.mrb[52].mxu0 %v5389_v37  ;;  %4063 = vmatpush1.bf16.msra.mxu1 %v4944_v56  ;;  %v6458_v37 = vld [vmem:[%s7089_s2] sm:$0x3f] }
 0x180   : > { %3380 = vmatpush1.bf16.msra.mxu0 %v4944_v56  ;;  %2968 = vmatprep.mubr.bf16.mxu1 %v7184_v36  ;;  %7185 = vst [vmem:[#allocation41_spill] sm:$0xff] %v6458_v37  ;;  %v687_v56 = vsub.s32 1, %v6437_v57  ;;  %v6469_v36 = vrot.slane %v6458_v37, %v683_v54  ;;  %v4950_v57 = vld [vmem:[%s7088_s1 + $0x6d0] ss:$24 sps:$4 sm:$0xff]   ;;  %v7190_v54 = vld [vmem:[#allocation13_spill] sm:$0xff] }
 0x181   : > { %3274 = vmatprep.mubr.bf16.mxu0 %v5399_v41  ;;  %v6461_v31 = vpop.f32.mrb[44].mxu1  ;;  %3381 = vmatprep.subr.bf16.mxu0 %v4949_v25 }
 0x182   : > { %4048 = vmatprep.subr.bf16.mxu1 %v4949_v25  ;;  %v6463_v10 = vpop.f32.mrb[45].mxu1  ;;  %v6477_v25 = vrot.slane %v6458_v37, %v687_v56  ;;  %v4953_v56 = vld [vmem:[%s7088_s1 + $0x700] ss:$24 sps:$4 sm:$0xff]  }
 0x183   : > { %7186 = vst [vmem:[#allocation42_spill] sm:$0xff] %v6463_v10  ;;  %v6466_v41 = vpop.f32.mrb[46].mxu1  ;;  %4064 = vmatpush1.bf16.msra.mxu1 %v4947_v30 }
 0x184   : > { %7187 = vst [vmem:[#allocation43_spill] sm:$0xff] %v6466_v41  ;;  %3382 = vmatpush1.bf16.msra.mxu0 %v4947_v30  ;;  %v6471_v16 = vpop.f32.mrb[47].mxu1  ;;  %4049 = vmatprep.subr.bf16.mxu1 %v4952_v2  ;;  %v4955_v30 = vld [vmem:[%s7088_s1 + $0x704] ss:$24 sps:$4 sm:$0xff]   ;;  %v2188_v37 = vadd.f32 %v6181_v50, %v6477_v25 }
 0x185   : > { %7188 = vst [vmem:[#allocation44_spill] sm:$0xff] %v6471_v16  ;;  %3383 = vmatprep.subr.bf16.mxu0 %v4952_v2  ;;  %v7189_v41 = vld [vmem:[#allocation12_spill] sm:$0xff]  ;;  %v2186_v2 = vadd.f32 %v6173_v51, %v6469_v36 }
 0x186   : > { %2969 = vmatmul.mubr.bf16.gmra.mrb[56].mxu1 %v7189_v41 }
 0x187   : > { %3275 = vmatmul.mubr.bf16.gmra.mrb[56].mxu0 %v5433_v59  ;;  %2978 = vmatprep.mubr.bf16.mxu1 %v7190_v54  ;;  %v4958_v59 = vld [vmem:[%s7088_s1 + $0x734] ss:$24 sps:$4 sm:$0xff]  }
 0x188   : > { %3284 = vmatprep.mubr.bf16.mxu0 %v5437_v61  ;;  %3384 = vmatpush1.bf16.msra.mxu0 %v4950_v57  ;;  %v2190_v61 = vadd.f32 %v6183_v55, %v6469_v36  ;;  %v4956_v55 = vld [vmem:[%s7088_s1 + $0x730] ss:$24 sps:$4 sm:$0xff]  }
 0x189   : > { %4065 = vmatpush1.bf16.msra.mxu1 %v4950_v57  ;;  %3385 = vmatprep.subr.bf16.mxu0 %v4955_v30  ;;  %v2192_v57 = vadd.f32 %v6185_v24, %v6477_v25  ;;  %v4961_v24 = vld [vmem:[%s7088_s1 + $0x764] ss:$24 sps:$4 sm:$0xff]  }
 0x18a   : > { %v2491_v16 = vpop.f32.mrb[0].mxu0  ;;  %4050 = vmatprep.subr.bf16.mxu1 %v4955_v30 }
 0x18b   : > { %v4078_v51 = vadd.f32 %v2491_v16, %v2186_v2  ;;  %v2493_v54 = vpop.f32.mrb[1].mxu0  ;;  %v2198_v2 = vadd.f32 %v6217_v13, %v6477_v25 }
 0x18c   : > { %v4080_v41 = vadd.f32 %v2493_v54, %v2188_v37  ;;  %v2495_v10 = vpop.f32.mrb[2].mxu0  ;;  %3386 = vmatpush1.bf16.msra.mxu0 %v4953_v56  ;;  %v7191_v37 = vld [vmem:[#allocation14_spill] sm:$0xff]  ;;  %v4959_v54 = vld [vmem:[%s7088_s1 + $0x760] ss:$24 sps:$4 sm:$0xff]  }
 0x18d   : > { %3528 = vst [vmem:[%s6502_s4] sm:$0xff] %v4078_v51  ;;  %v4082_v50 = vadd.f32 %v2495_v10, %v2190_v61  ;;  %v2497_v30 = vpop.f32.mrb[3].mxu0  ;;  %4066 = vmatpush1.bf16.msra.mxu1 %v4953_v56  ;;  %3387 = vmatprep.subr.bf16.mxu0 %v4958_v59  ;;  %v7192_v10 = vld [vmem:[#allocation15_spill] sm:$0xff]  ;;  %v2202_v61 = vadd.f32 %v6221_v15, %v6477_v25  ;;  %v4967_v15 = vld [vmem:[%s7088_s1 + $0x7c4] ss:$24 sps:$4 sm:$0xff]  }
 0x18e   : > { %3529 = vst [vmem:[%s6502_s4 + $0x8] sm:$0xff] %v4080_v41  ;;  %v4084_v16 = vadd.f32 %v2497_v30, %v2192_v57  ;;  %4051 = vmatprep.subr.bf16.mxu1 %v4958_v59  ;;  %2979 = vmatmul.mubr.bf16.gmra.mrb[60].mxu1 %v7191_v37  ;;  %v2196_v41 = vadd.f32 %v6209_v53, %v6469_v36  ;;  %v4962_v30 = vld [vmem:[%s7088_s1 + $0x790] ss:$24 sps:$4 sm:$0xff]  }
 0x18f   : > { %3534 = vst [vmem:[%s6502_s4 + $0x30] sm:$0xff] %v4082_v50  ;;  %3285 = vmatmul.mubr.bf16.gmra.mrb[60].mxu0 %v5477_v17  ;;  %2988 = vmatprep.mubr.bf16.mxu1 %v7192_v10  ;;  %v4964_v17 = vld [vmem:[%s7088_s1 + $0x794] ss:$24 sps:$4 sm:$0xff]  }
 0x190   : > { %3535 = vst [vmem:[%s6502_s4 + $0x38] sm:$0xff] %v4084_v16  ;;  %3294 = vmatprep.mubr.bf16.mxu0 %v5481_v19  ;;  %3388 = vmatpush1.bf16.msra.mxu0 %v4956_v55  ;;  %v2200_v19 = vadd.f32 %v6219_v26, %v6469_v36  ;;  %v7194_v16 = vld [vmem:[#allocation17_spill] sm:$0xff] }
 0x191   : > { %4067 = vmatpush1.bf16.msra.mxu1 %v4956_v55  ;;  %3389 = vmatprep.subr.bf16.mxu0 %v4961_v24  ;;  %v7193_v55 = vld [vmem:[#allocation16_spill] sm:$0xff] }
 0x192   : > { %v2501_v56 = vpop.f32.mrb[4].mxu0  ;;  %4052 = vmatprep.subr.bf16.mxu1 %v4961_v24  ;;  %v2206_v24 = vadd.f32 %v6245_v39, %v6469_v36 }
 0x193   : > { %v4086_v53 = vadd.f32 %v2501_v56, %v2196_v41  ;;  %v2503_v59 = vpop.f32.mrb[5].mxu0  ;;  %v4965_v41 = vld [vmem:[%s7088_s1 + $0x7c0] ss:$24 sps:$4 sm:$0xff]  }
 0x194   : > { %v4088_v51 = vadd.f32 %v2503_v59, %v2198_v2  ;;  %v2505_v13 = vpop.f32.mrb[6].mxu0  ;;  %3390 = vmatpush1.bf16.msra.mxu0 %v4959_v54 }
 0x195   : > { %3540 = vst [vmem:[%s6502_s4 + $0x60] sm:$0xff] %v4086_v53  ;;  %v4090_v57 = vadd.f32 %v2505_v13, %v2200_v19  ;;  %v2507_v50 = vpop.f32.mrb[7].mxu0  ;;  %4068 = vmatpush1.bf16.msra.mxu1 %v4959_v54  ;;  %3391 = vmatprep.subr.bf16.mxu0 %v4964_v17  ;;  %v2208_v54 = vadd.f32 %v6253_v40, %v6477_v25  ;;  %v7196_v13 = vld [vmem:[#allocation19_spill] sm:$0xff] }
 0x196   : > { %3541 = vst [vmem:[%s6502_s4 + $0x68] sm:$0xff] %v4088_v51  ;;  %v4092_v26 = vadd.f32 %v2507_v50, %v2202_v61  ;;  %4053 = vmatprep.subr.bf16.mxu1 %v4964_v17  ;;  %2989 = vmatmul.mubr.bf16.gmra.mrb[64].mxu1 %v7193_v55  ;;  %v2212_v17 = vadd.f32 %v6257_v18, %v6477_v25  ;;  %v4968_v61 = vld [vmem:[%s7088_s1 + $0x7f0] ss:$24 sps:$4 sm:$0xff]   ;;  %v4973_v18 = vld [vmem:[%s7088_s1 + $0x824] ss:$24 sps:$4 sm:$0xff]  }
 0x197   : > { %3546 = vst [vmem:[%s6502_s4 + $0x90] sm:$0xff] %v4090_v57  ;;  %3295 = vmatmul.mubr.bf16.gmra.mrb[64].mxu0 %v5521_v43  ;;  %2998 = vmatprep.mubr.bf16.mxu1 %v7194_v16  ;;  %v4970_v43 = vld [vmem:[%s7088_s1 + $0x7f4] ss:$24 sps:$4 sm:$0xff]   ;;  %v2216_v57 = vadd.f32 %v6281_v42, %v6469_v36  ;;  %v4971_v50 = vld [vmem:[%s7088_s1 + $0x820] ss:$24 sps:$4 sm:$0xff]  }
 0x198   : > { %3547 = vst [vmem:[%s6502_s4 + $0x98] sm:$0xff] %v4092_v26  ;;  %3304 = vmatprep.mubr.bf16.mxu0 %v5525_v45  ;;  %3392 = vmatpush1.bf16.msra.mxu0 %v4962_v30  ;;  %v2210_v45 = vadd.f32 %v6255_v14, %v6469_v36  ;;  %v7195_v51 = vld [vmem:[#allocation18_spill] sm:$0xff] }
 0x199   : > { %4069 = vmatpush1.bf16.msra.mxu1 %v4962_v30  ;;  %3393 = vmatprep.subr.bf16.mxu0 %v4967_v15  ;;  %v2218_v30 = vadd.f32 %v6289_v44, %v6477_v25 }
 0x19a   : > { %v2511_v2 = vpop.f32.mrb[8].mxu0  ;;  %4054 = vmatprep.subr.bf16.mxu1 %v4967_v15 }
 0x19b   : > { %v4094_v39 = vadd.f32 %v2511_v2, %v2206_v24  ;;  %v2513_v56 = vpop.f32.mrb[9].mxu0  ;;  %v2222_v24 = vadd.f32 %v6293_v60, %v6477_v25  ;;  %v4979_v60 = vld [vmem:[%s7088_s1 + $0x884] ss:$24 sps:$4 sm:$0xff]  }
 0x19c   : > { %v4096_v19 = vadd.f32 %v2513_v56, %v2208_v54  ;;  %v2515_v40 = vpop.f32.mrb[10].mxu0  ;;  %3394 = vmatpush1.bf16.msra.mxu0 %v4965_v41  ;;  %v2226_v56 = vadd.f32 %v6317_v4, %v6469_v36 }
 0x19d   : > { %3552 = vst [vmem:[%s6502_s4 + $0xc0] sm:$0xff] %v4094_v39  ;;  %v4098_v53 = vadd.f32 %v2515_v40, %v2210_v45  ;;  %v2517_v59 = vpop.f32.mrb[11].mxu0  ;;  %4070 = vmatpush1.bf16.msra.mxu1 %v4965_v41  ;;  %3395 = vmatprep.subr.bf16.mxu0 %v4970_v43  ;;  %v7197_v45 = vld [vmem:[#allocation20_spill] sm:$0xff]  ;;  %v7198_v39 = vld [vmem:[#allocation21_spill] sm:$0xff] }
 0x19e   : > { %3553 = vst [vmem:[%s6502_s4 + $0xc8] sm:$0xff] %v4096_v19  ;;  %v4100_v14 = vadd.f32 %v2517_v59, %v2212_v17  ;;  %4055 = vmatprep.subr.bf16.mxu1 %v4970_v43  ;;  %2999 = vmatmul.mubr.bf16.gmra.mrb[68].mxu1 %v7195_v51  ;;  %v4974_v43 = vld [vmem:[%s7088_s1 + $0x850] ss:$24 sps:$4 sm:$0xff]   ;;  %v4977_v17 = vld [vmem:[%s7088_s1 + $0x880] ss:$24 sps:$4 sm:$0xff]   ;;  %v2228_v19 = vadd.f32 %v6325_v6, %v6477_v25 }
 0x19f   : > { %3558 = vst [vmem:[%s6502_s4 + $0xf0] sm:$0xff] %v4098_v53  ;;  %3305 = vmatmul.mubr.bf16.gmra.mrb[68].mxu0 %v5565_v5  ;;  %3008 = vmatprep.mubr.bf16.mxu1 %v7196_v13  ;;  %v4976_v5 = vld [vmem:[%s7088_s1 + $0x854] ss:$24 sps:$4 sm:$0xff]   ;;  %v2232_v59 = vadd.f32 %v6329_v20, %v6477_v25  ;;  %v4985_v20 = vld [vmem:[%s7088_s1 + $0x8e4] ss:$24 sps:$4 sm:$0xff]  }
 0x1a0   : > { %3559 = vst [vmem:[%s6502_s4 + $0xf8] sm:$0xff] %v4100_v14  ;;  %3314 = vmatprep.mubr.bf16.mxu0 %v5569_v7  ;;  %3396 = vmatpush1.bf16.msra.mxu0 %v4968_v61  ;;  %v2220_v7 = vadd.f32 %v6291_v58, %v6469_v36 }
 0x1a1   : > { %4071 = vmatpush1.bf16.msra.mxu1 %v4968_v61  ;;  %3397 = vmatprep.subr.bf16.mxu0 %v4973_v18 }
 0x1a2   : > { %v2521_v26 = vpop.f32.mrb[12].mxu0  ;;  %4056 = vmatprep.subr.bf16.mxu1 %v4973_v18 }
 0x1a3   : > { %v4102_v42 = vadd.f32 %v2521_v26, %v2216_v57  ;;  %v2523_v15 = vpop.f32.mrb[13].mxu0  ;;  %v4980_v57 = vld [vmem:[%s7088_s1 + $0x8b0] ss:$24 sps:$4 sm:$0xff]   ;;  %v2236_v26 = vadd.f32 %v6353_v32, %v6469_v36 }
 0x1a4   : > { %v4104_v41 = vadd.f32 %v2523_v15, %v2218_v30  ;;  %v2525_v44 = vpop.f32.mrb[14].mxu0  ;;  %3398 = vmatpush1.bf16.msra.mxu0 %v4971_v50  ;;  %v7200_v30 = vld [vmem:[#allocation23_spill] sm:$0xff]  ;;  %v2242_v15 = vadd.f32 %v6362_v62, %v6477_v25  ;;  %v2248_v62 = vadd.f32 %v6370_v52, %v6477_v25  ;;  %v7201_v52 = vld [vmem:[#allocation24_spill] sm:$0xff] }
 0x1a5   : > { %3564 = vst [vmem:[%s6502_s4 + $0x120] sm:$0xff] %v4102_v42  ;;  %v4106_v54 = vadd.f32 %v2525_v44, %v2220_v7  ;;  %v2527_v2 = vpop.f32.mrb[15].mxu0  ;;  %4072 = vmatpush1.bf16.msra.mxu1 %v4971_v50  ;;  %3399 = vmatprep.subr.bf16.mxu0 %v4976_v5  ;;  %v7199_v50 = vld [vmem:[#allocation22_spill] sm:$0xff]  ;;  %v2238_v7 = vadd.f32 %v6358_v34, %v6477_v25 }
 0x1a6   : > { %3565 = vst [vmem:[%s6502_s4 + $0x128] sm:$0xff] %v4104_v41  ;;  %v4108_v58 = vadd.f32 %v2527_v2, %v2222_v24  ;;  %4057 = vmatprep.subr.bf16.mxu1 %v4976_v5  ;;  %3009 = vmatmul.mubr.bf16.gmra.mrb[72].mxu1 %v7197_v45  ;;  %v4983_v5 = vld [vmem:[%s7088_s1 + $0x8e0] ss:$24 sps:$4 sm:$0xff]  }
 0x1a7   : > { %3570 = vst [vmem:[%s6502_s4 + $0x150] sm:$0xff] %v4106_v54  ;;  %3315 = vmatmul.mubr.bf16.gmra.mrb[72].mxu0 %v5609_v33  ;;  %3018 = vmatprep.mubr.bf16.mxu1 %v7198_v39  ;;  %v4982_v33 = vld [vmem:[%s7088_s1 + $0x8b4] ss:$24 sps:$4 sm:$0xff]  }
 0x1a8   : > { %3571 = vst [vmem:[%s6502_s4 + $0x158] sm:$0xff] %v4108_v58  ;;  %3324 = vmatprep.mubr.bf16.mxu0 %v5613_v35  ;;  %3400 = vmatpush1.bf16.msra.mxu0 %v4974_v43  ;;  %v2230_v35 = vadd.f32 %v6327_v12, %v6469_v36 }
 0x1a9   : > { %4073 = vmatpush1.bf16.msra.mxu1 %v4974_v43  ;;  %3401 = vmatprep.subr.bf16.mxu0 %v4979_v60  ;;  %v2250_v43 = vadd.f32 %v6372_v63, %v6469_v36  ;;  %v7202_v63 = vld [vmem:[#allocation25_spill] sm:$0xff] }
 0x1aa   : > { %v2531_v40 = vpop.f32.mrb[16].mxu0  ;;  %4058 = vmatprep.subr.bf16.mxu1 %v4979_v60  ;;  %v2252_v60 = vadd.f32 %v6374_v23, %v6477_v25  ;;  %v7203_v23 = vld [vmem:[#allocation29_spill] sm:$0xff] }
 0x1ab   : > { %v4110_v4 = vadd.f32 %v2531_v40, %v2226_v56  ;;  %v2533_v53 = vpop.f32.mrb[17].mxu0  ;;  %v2256_v40 = vadd.f32 %v7203_v23, %v6469_v36 }
 0x1ac   : > { %v4112_v61 = vadd.f32 %v2533_v53, %v2228_v19  ;;  %v2535_v6 = vpop.f32.mrb[18].mxu0  ;;  %3402 = vmatpush1.bf16.msra.mxu0 %v4977_v17 }
 0x1ad   : > { %3576 = vst [vmem:[%s6502_s4 + $0x180] sm:$0xff] %v4110_v4  ;;  %v4114_v14 = vadd.f32 %v2535_v6, %v2230_v35  ;;  %v2537_v18 = vpop.f32.mrb[19].mxu0  ;;  %4074 = vmatpush1.bf16.msra.mxu1 %v4977_v17  ;;  %3403 = vmatprep.subr.bf16.mxu0 %v4982_v33  ;;  %v2260_v4 = vadd.f32 %v6384_v48, %v6469_v36  ;;  %v7206_v48 = vld [vmem:[#allocation27_spill] sm:$0xff] }
 0x1ae   : > { %3577 = vst [vmem:[%s6502_s4 + $0x188] sm:$0xff] %v4112_v61  ;;  %v4116_v12 = vadd.f32 %v2537_v18, %v2232_v59  ;;  %4059 = vmatprep.subr.bf16.mxu1 %v4982_v33  ;;  %3019 = vmatmul.mubr.bf16.gmra.mrb[76].mxu1 %v7199_v50  ;;  %v2258_v33 = vadd.f32 %v6382_v22, %v6477_v25  ;;  %v7204_v59 = vld [vmem:[#allocation30_spill] sm:$0xff] }
 0x1af   : > { %3582 = vst [vmem:[%s6502_s4 + $0x1b0] sm:$0xff] %v4114_v14  ;;  %3325 = vmatmul.mubr.bf16.gmra.mrb[76].mxu0 %v5653_v3  ;;  %3028 = vmatprep.mubr.bf16.mxu1 %v7200_v30  ;;  %v2262_v61 = vadd.f32 %v7204_v59, %v6477_v25  ;;  %v7205_v22 = vld [vmem:[#allocation26_spill] sm:$0xff] }
 0x1b0   : > { %3583 = vst [vmem:[%s6502_s4 + $0x1b8] sm:$0xff] %v4116_v12  ;;  %3334 = vmatprep.mubr.bf16.mxu0 %v5657_v9  ;;  %3404 = vmatpush1.bf16.msra.mxu0 %v4980_v57  ;;  %v2240_v9 = vadd.f32 %v6360_v8, %v6469_v36  ;;  %v2246_v8 = vadd.f32 %v6368_v38, %v6469_v36  ;;  %v7207_v12 = vld [vmem:[#allocation5_spill] sm:$0xff] }
 0x1b1   : > { %4075 = vmatpush1.bf16.msra.mxu1 %v4980_v57  ;;  %3405 = vmatprep.subr.bf16.mxu0 %v4985_v20 }
 0x1b2   : > { %v2541_v3 = vpop.f32.mrb[20].mxu0  ;;  %4060 = vmatprep.subr.bf16.mxu1 %v4985_v20  ;;  %v2266_v20 = vadd.f32 %v6392_v0, %v6469_v36 }
 0x1b3   : > { %v4118_v42 = vadd.f32 %v2541_v3, %v2236_v26  ;;  %v2543_v32 = vpop.f32.mrb[21].mxu0  ;;  %v7208_v26 = vld [vmem:[#allocation31_spill] sm:$0xff]  ;;  %v7209_v3 = vld [vmem:[#allocation32_spill] sm:$0xff] }
 0x1b4   : > { %v4120_v24 = vadd.f32 %v2543_v32, %v2238_v7  ;;  %v2545_v41 = vpop.f32.mrb[22].mxu0  ;;  %3406 = vmatpush1.bf16.msra.mxu0 %v4983_v5  ;;  %v2272_v32 = vadd.f32 %v6398_v46, %v6477_v25  ;;  %v7213_v46 = vld [vmem:[#allocation33_spill] sm:$0xff] }
 0x1b5   : > { %3588 = vst [vmem:[%s6502_s4 + $0x1e0] sm:$0xff] %v4118_v42  ;;  %v4122_v44 = vadd.f32 %v2545_v41, %v2240_v9  ;;  %v2547_v54 = vpop.f32.mrb[23].mxu0  ;;  %4076 = vmatpush1.bf16.msra.mxu1 %v4983_v5  ;;  %v2268_v5 = vadd.f32 %v7208_v26, %v6477_v25  ;;  %v2270_v9 = vadd.f32 %v7209_v3, %v6469_v36 }
 0x1b6   : > { %3589 = vst [vmem:[%s6502_s4 + $0x1e8] sm:$0xff] %v4120_v24  ;;  %v4124_v34 = vadd.f32 %v2547_v54, %v2242_v15  ;;  %3029 = vmatmul.mubr.bf16.gmra.mrb[80].mxu1 %v6055_v21  ;;  %v7210_v54 = vld [vmem:[#allocation28_spill] sm:$0xff]  ;;  %v2296_v3 = vadd.f32 %v6461_v31, %v6469_v36 }
 0x1b7   : > { %3594 = vst [vmem:[%s6502_s4 + $0x210] sm:$0xff] %v4122_v44  ;;  %3335 = vmatmul.mubr.bf16.gmra.mrb[80].mxu0 %v5697_v47  ;;  %3038 = vmatprep.mubr.bf16.mxu1 %v6057_v27 }
 0x1b8   : > { %3595 = vst [vmem:[%s6502_s4 + $0x218] sm:$0xff] %v4124_v34  ;;  %3344 = vmatprep.mubr.bf16.mxu0 %v5701_v49  ;;  %v7211_v34 = vld [vmem:[#allocation6_spill] sm:$0xff] }
 0x1ba   : > { %v2551_v2 = vpop.f32.mrb[24].mxu0 }
 0x1bb   : > { %v4126_v58 = vadd.f32 %v2551_v2, %v2246_v8  ;;  %v2553_v47 = vpop.f32.mrb[25].mxu0  ;;  %v7212_v8 = vld [vmem:[#allocation7_spill] sm:$0xff]  ;;  %v7214_v2 = vld [vmem:[#allocation34_spill] sm:$0xff] }
 0x1bc   : > { %v4128_v56 = vadd.f32 %v2553_v47, %v2248_v62  ;;  %v2555_v17 = vpop.f32.mrb[26].mxu0  ;;  %v2276_v62 = vadd.f32 %v7213_v46, %v6469_v36  ;;  %v7215_v47 = vld [vmem:[#allocation35_spill] sm:$0xff]  ;;  %v7227_v46 = vld [vmem:[#allocation12_spill] sm:$0xff] }
 0x1bd   : > { %3600 = vst [vmem:[%s6502_s4 + $0x240] sm:$0xff] %v4126_v58  ;;  %v4130_v49 = vadd.f32 %v2555_v17, %v2250_v43  ;;  %v2557_v19 = vpop.f32.mrb[27].mxu0  ;;  %v2278_v43 = vadd.f32 %v7214_v2, %v6477_v25 }
 0x1be   : > { %3601 = vst [vmem:[%s6502_s4 + $0x248] sm:$0xff] %v4128_v56  ;;  %v4132_v38 = vadd.f32 %v2557_v19, %v2252_v60  ;;  %3039 = vmatmul.mubr.bf16.gmra.mrb[84].mxu1 %v7201_v52  ;;  %v2280_v60 = vadd.f32 %v7215_v47, %v6469_v36 }
 0x1bf   : > { %3606 = vst [vmem:[%s6502_s4 + $0x270] sm:$0xff] %v4130_v49  ;;  %3345 = vmatmul.mubr.bf16.gmra.mrb[84].mxu0 %v5717_v1  ;;  %3048 = vmatprep.mubr.bf16.mxu1 %v7202_v63  ;;  %v7216_v49 = vld [vmem:[#allocation36_spill] sm:$0xff] }
 0x1c0   : > { %3607 = vst [vmem:[%s6502_s4 + $0x278] sm:$0xff] %v4132_v38  ;;  %3354 = vmatprep.mubr.bf16.mxu0 %v5721_v11  ;;  %v2282_v19 = vadd.f32 %v7216_v49, %v6477_v25 }
 0x1c2   : > { %v2561_v35 = vpop.f32.mrb[28].mxu0 }
 0x1c3   : > { %v4134_v53 = vadd.f32 %v2561_v35, %v2256_v40  ;;  %v2563_v1 = vpop.f32.mrb[29].mxu0  ;;  %v7217_v35 = vld [vmem:[#allocation8_spill] sm:$0xff] }
 0x1c4   : > { %v4136_v6 = vadd.f32 %v2563_v1, %v2258_v33  ;;  %v2565_v14 = vpop.f32.mrb[30].mxu0  ;;  %v7219_v1 = vld [vmem:[#allocation9_spill] sm:$0xff] }
 0x1c5   : > { %3612 = vst [vmem:[%s6502_s4 + $0x2a0] sm:$0xff] %v4134_v53  ;;  %v4138_v11 = vadd.f32 %v2565_v14, %v2260_v4  ;;  %v2567_v18 = vpop.f32.mrb[31].mxu0  ;;  %v7218_v4 = vld [vmem:[#allocation37_spill] sm:$0xff]  ;;  %v2288_v59 = vadd.f32 %v7219_v1, %v6477_v25 }
 0x1c6   : > { %3613 = vst [vmem:[%s6502_s4 + $0x2a8] sm:$0xff] %v4136_v6  ;;  %v4140_v57 = vadd.f32 %v2567_v18, %v2262_v61  ;;  %3049 = vmatmul.mubr.bf16.gmra.mrb[88].mxu1 %v7205_v22  ;;  %v2286_v53 = vadd.f32 %v7218_v4, %v6469_v36  ;;  %v7220_v6 = vld [vmem:[#allocation38_spill] sm:$0xff]  ;;  %v7221_v18 = vld [vmem:[#allocation40_spill] sm:$0xff] }
 0x1c7   : > { %3618 = vst [vmem:[%s6502_s4 + $0x2d0] sm:$0xff] %v4138_v11  ;;  %3355 = vmatmul.mubr.bf16.gmra.mrb[88].mxu0 %v5737_v29  ;;  %3058 = vmatprep.mubr.bf16.mxu1 %v7206_v48  ;;  %v2290_v14 = vadd.f32 %v7220_v6, %v6469_v36 }
 0x1c8   : > { %3619 = vst [vmem:[%s6502_s4 + $0x2d8] sm:$0xff] %v4140_v57  ;;  %3364 = vmatprep.mubr.bf16.mxu0 %v7207_v12  ;;  %v2292_v57 = vadd.f32 %v7221_v18, %v6477_v25 }
 0x1ca   : > { %v2571_v7 = vpop.f32.mrb[32].mxu0 }
 0x1cb   : > { %v4142_v42 = vadd.f32 %v2571_v7, %v2266_v20  ;;  %v2573_v29 = vpop.f32.mrb[33].mxu0  ;;  %v7223_v7 = vld [vmem:[#allocation11_spill] sm:$0xff] }
 0x1cc   : > { %v4144_v15 = vadd.f32 %v2573_v29, %v2268_v5  ;;  %v2575_v24 = vpop.f32.mrb[34].mxu0  ;;  %v7222_v5 = vld [vmem:[#allocation10_spill] sm:$0xff] }
 0x1cd   : > { %3624 = vst [vmem:[%s6502_s4 + $0x300] sm:$0xff] %v4142_v42  ;;  %v4146_v41 = vadd.f32 %v2575_v24, %v2270_v9  ;;  %v2577_v44 = vpop.f32.mrb[35].mxu0  ;;  %v7224_v9 = vld [vmem:[#allocation42_spill] sm:$0xff] }
 0x1ce   : > { %3625 = vst [vmem:[%s6502_s4 + $0x308] sm:$0xff] %v4144_v15  ;;  %v4148_v0 = vadd.f32 %v2577_v44, %v2272_v32  ;;  %3059 = vmatmul.mubr.bf16.gmra.mrb[92].mxu1 %v7210_v54  ;;  %v2298_v42 = vadd.f32 %v7224_v9, %v6477_v25  ;;  %v7225_v32 = vld [vmem:[#allocation43_spill] sm:$0xff] }
 0x1cf   : > { %3630 = vst [vmem:[%s6502_s4 + $0x330] sm:$0xff] %v4146_v41  ;;  %3365 = vmatmul.mubr.bf16.gmra.mrb[92].mxu0 %v7211_v34  ;;  %3467 = vmatprep.mubr.bf16.mxu1 %v7196_v13  ;;  %v2300_v15 = vadd.f32 %v7225_v32, %v6469_v36  ;;  %v7226_v41 = vld [vmem:[#allocation44_spill] sm:$0xff] }
 0x1d0   : > { %3631 = vst [vmem:[%s6502_s4 + $0x338] sm:$0xff] %v4148_v0  ;;  %3407 = vmatprep.mubr.bf16.mxu0 %v7212_v8  ;;  %v2302_v44 = vadd.f32 %v7226_v41, %v6477_v25  ;;  %v7230_v25 = vld [vmem:[#allocation41_spill] sm:$0xff] }
 0x1d2   : > { %v2581_v58 = vpop.f32.mrb[36].mxu0 }
 0x1d3   : > { %v4150_v56 = vadd.f32 %v2581_v58, %v2276_v62  ;;  %v2583_v17 = vpop.f32.mrb[37].mxu0  ;;  %v7228_v62 = vld [vmem:[#allocation13_spill] sm:$0xff] }
 0x1d4   : > { %v4152_v38 = vadd.f32 %v2583_v17, %v2278_v43  ;;  %v2585_v23 = vpop.f32.mrb[38].mxu0 }
 0x1d5   : > { %3636 = vst [vmem:[%s6502_s4 + $0x360] sm:$0xff] %v4150_v56  ;;  %v4154_v13 = vadd.f32 %v2585_v23, %v2280_v60  ;;  %v2587_v40 = vpop.f32.mrb[39].mxu0 }
 0x1d6   : > { %3637 = vst [vmem:[%s6502_s4 + $0x368] sm:$0xff] %v4152_v38  ;;  %v4156_v33 = vadd.f32 %v2587_v40, %v2282_v19  ;;  %3468 = vmatmul.mubr.bf16.vlgmr.msra.gmra.mrb[96].mxu1 %v7197_v45 }
 0x1d7   : > { %3642 = vst [vmem:[%s6502_s4 + $0x390] sm:$0xff] %v4154_v13  ;;  %3408 = vmatmul.mubr.bf16.vlgmr.msra.gmra.mrb[48].mxu0 %v7217_v35  ;;  %3477 = vmatprep.mubr.bf16.mxu1 %v7198_v39 }
 0x1d8   : > { %3643 = vst [vmem:[%s6502_s4 + $0x398] sm:$0xff] %v4156_v33  ;;  %3417 = vmatprep.mubr.bf16.mxu0 %v7178_v28 }
 0x1da   : > { %v2591_v61 = vpop.f32.mrb[40].mxu0 }
 0x1db   : > { %v4158_v11 = vadd.f32 %v2591_v61, %v2286_v53  ;;  %v2593_v45 = vpop.f32.mrb[41].mxu0 }
 0x1dc   : > { %v4160_v28 = vadd.f32 %v2593_v45, %v2288_v59  ;;  %v2595_v12 = vpop.f32.mrb[42].mxu0 }
 0x1dd   : > { %3648 = vst [vmem:[%s6502_s4 + $0x3c0] sm:$0xff] %v4158_v11  ;;  %v4162_v39 = vadd.f32 %v2595_v12, %v2290_v14  ;;  %v2597_v20 = vpop.f32.mrb[43].mxu0 }
 0x1de   : > { %3649 = vst [vmem:[%s6502_s4 + $0x3c8] sm:$0xff] %v4160_v28  ;;  %v4164_v26 = vadd.f32 %v2597_v20, %v2292_v57  ;;  %3478 = vmatmul.mubr.bf16.gmra.mrb[100].mxu1 %v7199_v50 }
 0x1df   : > { %3654 = vst [vmem:[%s6502_s4 + $0x3f0] sm:$0xff] %v4162_v39  ;;  %3418 = vmatmul.mubr.bf16.gmra.mrb[52].mxu0 %v7222_v5  ;;  %3487 = vmatprep.mubr.bf16.mxu1 %v7200_v30 }
 0x1e0   : > { %3655 = vst [vmem:[%s6502_s4 + $0x3f8] sm:$0xff] %v4164_v26  ;;  %3427 = vmatprep.mubr.bf16.mxu0 %v7223_v7 }
 0x1e2   : > { %v2601_v29 = vpop.f32.mrb[44].mxu0 }
 0x1e3   : > { %v4166_v24 = vadd.f32 %v2601_v29, %v2296_v3  ;;  %v2603_v50 = vpop.f32.mrb[45].mxu0 }
 0x1e4   : > { %v4168_v0 = vadd.f32 %v2603_v50, %v2298_v42  ;;  %v2605_v34 = vpop.f32.mrb[46].mxu0 }
 0x1e5   : > { %3660 = vst [vmem:[%s6502_s4 + $0x420] sm:$0xff] %v4166_v24  ;;  %v4170_v30 = vadd.f32 %v2605_v34, %v2300_v15  ;;  %v2607_v8 = vpop.f32.mrb[47].mxu0 }
 0x1e6   : > { %3661 = vst [vmem:[%s6502_s4 + $0x428] sm:$0xff] %v4168_v0  ;;  %v4172_v31 = vadd.f32 %v2607_v8, %v2302_v44  ;;  %3488 = vmatmul.mubr.bf16.gmra.mrb[104].mxu1 %v6055_v21 }
 0x1e7   : > { %3666 = vst [vmem:[%s6502_s4 + $0x450] sm:$0xff] %v4170_v30  ;;  %3428 = vmatmul.mubr.bf16.gmra.mrb[56].mxu0 %v7227_v46  ;;  %3497 = vmatprep.mubr.bf16.mxu1 %v6057_v27  ;;  %v7229_v27 = vld [vmem:[#allocation39_spill] sm:$0xff] }
 0x1e8   : > { %3667 = vst [vmem:[%s6502_s4 + $0x458] sm:$0xff] %v4172_v31  ;;  %3437 = vmatprep.mubr.bf16.mxu0 %v7228_v62  ;;  %v691_v21 = vsub.s32 2, %v7229_v27  ;;  %v695_v36 = vsub.s32 3, %v7229_v27 }
 0x1ee   : > { %3498 = vmatmul.mubr.bf16.gmra.mrb[108].mxu1 %v7201_v52 }
 0x1ef   : > { %3438 = vmatmul.mubr.bf16.gmra.mrb[60].mxu0 %v7191_v37  ;;  %3507 = vmatprep.mubr.bf16.mxu1 %v7202_v63  ;;  %v6758_v37 = vrot.slane %v7230_v25, %v691_v21 }
 0x1f0   : > { %3447 = vmatprep.mubr.bf16.mxu0 %v7192_v10  ;;  %v6761_v10 = vrot.slane %v7230_v25, %v695_v36 }
 0x1f6   : > { %3508 = vmatmul.mubr.bf16.gmra.mrb[112].mxu1 %v7205_v22 }
 0x1f7   : > { %3448 = vmatmul.mubr.bf16.gmra.mrb[64].mxu0 %v7193_v55  ;;  %3517 = vmatprep.mubr.bf16.mxu1 %v7206_v48 }
 0x1f8   : > { %3457 = vmatprep.mubr.bf16.mxu0 %v7194_v16 }
 0x1fe   : > { %3518 = vmatmul.mubr.bf16.gmra.mrb[116].mxu1 %v7210_v54 }
 0x1ff   : > { %3458 = vmatmul.mubr.bf16.gmra.mrb[68].mxu0 %v7195_v51 }
 0x249   : > { %v2950_v55 = vpop.f32.mrb[48].mxu1 }
 0x24a   : > { %v4173_v16 = vadd.f32 %v2950_v55, %v6758_v37  ;;  %v2952_v52 = vpop.f32.mrb[49].mxu1 }
 0x24b   : > { %v4174_v51 = vadd.f32 %v2952_v52, %v6761_v10  ;;  %v2954_v63 = vpop.f32.mrb[50].mxu1 }
 0x24c   : > { %3530 = vst [vmem:[%s6502_s4 + $0x10] sm:$0xff] %v4173_v16  ;;  %v4175_v22 = vadd.f32 %v2954_v63, %v6758_v37  ;;  %v2956_v48 = vpop.f32.mrb[51].mxu1 }
 0x24d   : > { %3531 = vst [vmem:[%s6502_s4 + $0x18] sm:$0xff] %v4174_v51  ;;  %v4176_v54 = vadd.f32 %v2956_v48, %v6761_v10 }
 0x24e   : > { %3536 = vst [vmem:[%s6502_s4 + $0x40] sm:$0xff] %v4175_v22 }
 0x24f   : > { %3537 = vst [vmem:[%s6502_s4 + $0x48] sm:$0xff] %v4176_v54 }
 0x251   : > { %v2960_v2 = vpop.f32.mrb[52].mxu1 }
 0x252   : > { %v4177_v43 = vadd.f32 %v2960_v2, %v6758_v37  ;;  %v2962_v58 = vpop.f32.mrb[53].mxu1 }
 0x253   : > { %v4178_v47 = vadd.f32 %v2962_v58, %v6761_v10  ;;  %v2964_v60 = vpop.f32.mrb[54].mxu1 }
 0x254   : > { %3542 = vst [vmem:[%s6502_s4 + $0x70] sm:$0xff] %v4177_v43  ;;  %v4179_v56 = vadd.f32 %v2964_v60, %v6758_v37  ;;  %v2966_v17 = vpop.f32.mrb[55].mxu1 }
 0x255   : > { %3543 = vst [vmem:[%s6502_s4 + $0x78] sm:$0xff] %v4178_v47  ;;  %v4180_v49 = vadd.f32 %v2966_v17, %v6761_v10 }
 0x256   : > { %3548 = vst [vmem:[%s6502_s4 + $0xa0] sm:$0xff] %v4179_v56 }
 0x257   : > { %3549 = vst [vmem:[%s6502_s4 + $0xa8] sm:$0xff] %v4180_v49 }
 0x259   : > { %v2970_v19 = vpop.f32.mrb[56].mxu1 }
 0x25a   : > { %v4181_v38 = vadd.f32 %v2970_v19, %v6758_v37  ;;  %v2972_v23 = vpop.f32.mrb[57].mxu1 }
 0x25b   : > { %v4182_v13 = vadd.f32 %v2972_v23, %v6761_v10  ;;  %v2974_v40 = vpop.f32.mrb[58].mxu1 }
 0x25c   : > { %3554 = vst [vmem:[%s6502_s4 + $0xd0] sm:$0xff] %v4181_v38  ;;  %v4183_v33 = vadd.f32 %v2974_v40, %v6758_v37  ;;  %v2976_v35 = vpop.f32.mrb[59].mxu1 }
 0x25d   : > { %3555 = vst [vmem:[%s6502_s4 + $0xd8] sm:$0xff] %v4182_v13  ;;  %v4184_v4 = vadd.f32 %v2976_v35, %v6761_v10 }
 0x25e   : > { %3560 = vst [vmem:[%s6502_s4 + $0x100] sm:$0xff] %v4183_v33 }
 0x25f   : > { %3561 = vst [vmem:[%s6502_s4 + $0x108] sm:$0xff] %v4184_v4 }
 0x261   : > { %v2980_v53 = vpop.f32.mrb[60].mxu1 }
 0x262   : > { %v4185_v1 = vadd.f32 %v2980_v53, %v6758_v37  ;;  %v2982_v59 = vpop.f32.mrb[61].mxu1 }
 0x263   : > { %v4186_v61 = vadd.f32 %v2982_v59, %v6761_v10  ;;  %v2984_v6 = vpop.f32.mrb[62].mxu1 }
 0x264   : > { %3566 = vst [vmem:[%s6502_s4 + $0x130] sm:$0xff] %v4185_v1  ;;  %v4187_v14 = vadd.f32 %v2984_v6, %v6758_v37  ;;  %v2986_v11 = vpop.f32.mrb[63].mxu1 }
 0x265   : > { %3567 = vst [vmem:[%s6502_s4 + $0x138] sm:$0xff] %v4186_v61  ;;  %v4188_v45 = vadd.f32 %v2986_v11, %v6761_v10 }
 0x266   : > { %3572 = vst [vmem:[%s6502_s4 + $0x160] sm:$0xff] %v4187_v14 }
 0x267   : > { %3573 = vst [vmem:[%s6502_s4 + $0x168] sm:$0xff] %v4188_v45 }
 0x269   : > { %v2990_v18 = vpop.f32.mrb[64].mxu1 }
 0x26a   : > { %v4189_v57 = vadd.f32 %v2990_v18, %v6758_v37  ;;  %v2992_v28 = vpop.f32.mrb[65].mxu1 }
 0x26b   : > { %v4190_v12 = vadd.f32 %v2992_v28, %v6761_v10  ;;  %v2994_v39 = vpop.f32.mrb[66].mxu1 }
 0x26c   : > { %3578 = vst [vmem:[%s6502_s4 + $0x190] sm:$0xff] %v4189_v57  ;;  %v4191_v20 = vadd.f32 %v2994_v39, %v6758_v37  ;;  %v2996_v26 = vpop.f32.mrb[67].mxu1 }
 0x26d   : > { %3579 = vst [vmem:[%s6502_s4 + $0x198] sm:$0xff] %v4190_v12  ;;  %v4192_v5 = vadd.f32 %v2996_v26, %v6761_v10 }
 0x26e   : > { %3584 = vst [vmem:[%s6502_s4 + $0x1c0] sm:$0xff] %v4191_v20 }
 0x26f   : > { %3585 = vst [vmem:[%s6502_s4 + $0x1c8] sm:$0xff] %v4192_v5 }
 0x271   : > { %v3000_v7 = vpop.f32.mrb[68].mxu1 }
 0x272   : > { %v4193_v3 = vadd.f32 %v3000_v7, %v6758_v37  ;;  %v3002_v9 = vpop.f32.mrb[69].mxu1 }
 0x273   : > { %v4194_v42 = vadd.f32 %v3002_v9, %v6761_v10  ;;  %v3004_v29 = vpop.f32.mrb[70].mxu1 }
 0x274   : > { %3590 = vst [vmem:[%s6502_s4 + $0x1f0] sm:$0xff] %v4193_v3  ;;  %v4195_v32 = vadd.f32 %v3004_v29, %v6758_v37  ;;  %v3006_v15 = vpop.f32.mrb[71].mxu1 }
 0x275   : > { %3591 = vst [vmem:[%s6502_s4 + $0x1f8] sm:$0xff] %v4194_v42  ;;  %v4196_v24 = vadd.f32 %v3006_v15, %v6761_v10 }
 0x276   : > { %3596 = vst [vmem:[%s6502_s4 + $0x220] sm:$0xff] %v4195_v32 }
 0x277   : > { %3597 = vst [vmem:[%s6502_s4 + $0x228] sm:$0xff] %v4196_v24 }
 0x279   : > { %v3010_v50 = vpop.f32.mrb[72].mxu1 }
 0x27a   : > { %v6811_v41 = vpop.f32.mrb[72].mxu0  ;;  %v4197_v44 = vadd.f32 %v3010_v50, %v6758_v37  ;;  %v3012_v0 = vpop.f32.mrb[73].mxu1  ;;  %v699_v50 = vsub.s32 4, %v7229_v27 }
 0x27b   : > { %v6814_v34 = vpop.f32.mrb[73].mxu0  ;;  %v4198_v30 = vadd.f32 %v3012_v0, %v6761_v10  ;;  %v3014_v8 = vpop.f32.mrb[74].mxu1 }
 0x27c   : > { %v6817_v31 = vpop.f32.mrb[74].mxu0  ;;  %3602 = vst [vmem:[%s6502_s4 + $0x250] sm:$0xff] %v4197_v44  ;;  %v4199_v46 = vadd.f32 %v3014_v8, %v6758_v37  ;;  %v3016_v62 = vpop.f32.mrb[75].mxu1  ;;  %v703_v44 = vsub.s32 5, %v7229_v27 }
 0x27d   : > { %v6821_v21 = vpop.f32.mrb[75].mxu0  ;;  %3603 = vst [vmem:[%s6502_s4 + $0x258] sm:$0xff] %v4198_v30  ;;  %v4200_v36 = vadd.f32 %v3016_v62, %v6761_v10 }
 0x27e   : > { %3608 = vst [vmem:[%s6502_s4 + $0x280] sm:$0xff] %v4199_v46 }
 0x27f   : > { %3609 = vst [vmem:[%s6502_s4 + $0x288] sm:$0xff] %v4200_v36 }
 0x281   : > { %v3020_v55 = vpop.f32.mrb[76].mxu1 }
 0x282   : > { %v6827_v16 = vpop.f32.mrb[76].mxu0  ;;  %v4201_v52 = vadd.f32 %v3020_v55, %v6758_v37  ;;  %v3022_v51 = vpop.f32.mrb[77].mxu1 }
 0x283   : > { %v6830_v63 = vpop.f32.mrb[77].mxu0  ;;  %v4202_v22 = vadd.f32 %v3022_v51, %v6761_v10  ;;  %v3024_v48 = vpop.f32.mrb[78].mxu1  ;;  %v6902_v51 = vrot.slane %v7230_v25, %v699_v50 }
 0x284   : > { %v6833_v54 = vpop.f32.mrb[78].mxu0  ;;  %3614 = vst [vmem:[%s6502_s4 + $0x2b0] sm:$0xff] %v4201_v52  ;;  %v4203_v2 = vadd.f32 %v3024_v48, %v6758_v37  ;;  %v3026_v43 = vpop.f32.mrb[79].mxu1 }
 0x285   : > { %v6837_v58 = vpop.f32.mrb[79].mxu0  ;;  %3615 = vst [vmem:[%s6502_s4 + $0x2b8] sm:$0xff] %v4202_v22  ;;  %v4204_v47 = vadd.f32 %v3026_v43, %v6761_v10 }
 0x286   : > { %3620 = vst [vmem:[%s6502_s4 + $0x2e0] sm:$0xff] %v4203_v2  ;;  %v6909_v2 = vrot.slane %v7230_v25, %v703_v44 }
 0x287   : > { %3621 = vst [vmem:[%s6502_s4 + $0x2e8] sm:$0xff] %v4204_v47  ;;  %v4245_v47 = vadd.f32 %v6811_v41, %v6902_v51 }
 0x289   : > { %v3030_v60 = vpop.f32.mrb[80].mxu1 }
 0x28a   : > { %v6843_v56 = vpop.f32.mrb[80].mxu0  ;;  %v4205_v17 = vadd.f32 %v3030_v60, %v6758_v37  ;;  %v3032_v49 = vpop.f32.mrb[81].mxu1  ;;  %v4247_v60 = vadd.f32 %v6814_v34, %v6909_v2 }
 0x28b   : > { %v6846_v19 = vpop.f32.mrb[81].mxu0  ;;  %v4206_v38 = vadd.f32 %v3032_v49, %v6761_v10  ;;  %v3034_v23 = vpop.f32.mrb[82].mxu1  ;;  %v4249_v49 = vadd.f32 %v6817_v31, %v6902_v51 }
 0x28c   : > { %v6849_v13 = vpop.f32.mrb[82].mxu0  ;;  %3626 = vst [vmem:[%s6502_s4 + $0x310] sm:$0xff] %v4205_v17  ;;  %v4207_v40 = vadd.f32 %v3034_v23, %v6758_v37  ;;  %v3036_v33 = vpop.f32.mrb[83].mxu1 }
 0x28d   : > { %v6853_v35 = vpop.f32.mrb[83].mxu0  ;;  %3627 = vst [vmem:[%s6502_s4 + $0x318] sm:$0xff] %v4206_v38  ;;  %v4208_v4 = vadd.f32 %v3036_v33, %v6761_v10 }
 0x28e   : > { %3632 = vst [vmem:[%s6502_s4 + $0x340] sm:$0xff] %v4207_v40  ;;  %v4251_v40 = vadd.f32 %v6821_v21, %v6909_v2 }
 0x28f   : > { %3633 = vst [vmem:[%s6502_s4 + $0x348] sm:$0xff] %v4208_v4 }
 0x291   : > { %v3040_v53 = vpop.f32.mrb[84].mxu1 }
 0x292   : > { %v6859_v1 = vpop.f32.mrb[84].mxu0  ;;  %v4209_v59 = vadd.f32 %v3040_v53, %v6758_v37  ;;  %v3042_v61 = vpop.f32.mrb[85].mxu1 }
 0x293   : > { %v6862_v6 = vpop.f32.mrb[85].mxu0  ;;  %v4210_v14 = vadd.f32 %v3042_v61, %v6761_v10  ;;  %v3044_v11 = vpop.f32.mrb[86].mxu1 }
 0x294   : > { %v6865_v45 = vpop.f32.mrb[86].mxu0  ;;  %3638 = vst [vmem:[%s6502_s4 + $0x370] sm:$0xff] %v4209_v59  ;;  %v4211_v18 = vadd.f32 %v3044_v11, %v6758_v37  ;;  %v3046_v57 = vpop.f32.mrb[87].mxu1  ;;  %v4253_v11 = vadd.f32 %v6827_v16, %v6902_v51 }
 0x295   : > { %v6869_v28 = vpop.f32.mrb[87].mxu0  ;;  %3639 = vst [vmem:[%s6502_s4 + $0x378] sm:$0xff] %v4210_v14  ;;  %v4212_v12 = vadd.f32 %v3046_v57, %v6761_v10 }
 0x296   : > { %3644 = vst [vmem:[%s6502_s4 + $0x3a0] sm:$0xff] %v4211_v18  ;;  %v4255_v18 = vadd.f32 %v6830_v63, %v6909_v2 }
 0x297   : > { %3645 = vst [vmem:[%s6502_s4 + $0x3a8] sm:$0xff] %v4212_v12 }
 0x299   : > { %v3050_v39 = vpop.f32.mrb[88].mxu1 }
 0x29a   : > { %v6875_v20 = vpop.f32.mrb[88].mxu0  ;;  %v4213_v26 = vadd.f32 %v3050_v39, %v6758_v37  ;;  %v3052_v5 = vpop.f32.mrb[89].mxu1  ;;  %v4257_v39 = vadd.f32 %v6833_v54, %v6902_v51 }
 0x29b   : > { %v6878_v7 = vpop.f32.mrb[89].mxu0  ;;  %v4214_v3 = vadd.f32 %v3052_v5, %v6761_v10  ;;  %v3054_v9 = vpop.f32.mrb[90].mxu1 }
 0x29c   : > { %v6881_v42 = vpop.f32.mrb[90].mxu0  ;;  %3650 = vst [vmem:[%s6502_s4 + $0x3d0] sm:$0xff] %v4213_v26  ;;  %v4215_v29 = vadd.f32 %v3054_v9, %v6758_v37  ;;  %v3056_v32 = vpop.f32.mrb[91].mxu1 }
 0x29d   : > { %v6885_v15 = vpop.f32.mrb[91].mxu0  ;;  %3651 = vst [vmem:[%s6502_s4 + $0x3d8] sm:$0xff] %v4214_v3  ;;  %v4216_v24 = vadd.f32 %v3056_v32, %v6761_v10 }
 0x29e   : > { %3656 = vst [vmem:[%s6502_s4 + $0x400] sm:$0xff] %v4215_v29  ;;  %v4259_v29 = vadd.f32 %v6837_v58, %v6909_v2 }
 0x29f   : > { %3657 = vst [vmem:[%s6502_s4 + $0x408] sm:$0xff] %v4216_v24 }
 0x2a1   : > { %v3060_v0 = vpop.f32.mrb[92].mxu1 }
 0x2a2   : > { %v6893_v30 = vpop.f32.mrb[92].mxu0  ;;  %v4217_v8 = vadd.f32 %v3060_v0, %v6758_v37  ;;  %v3062_v46 = vpop.f32.mrb[93].mxu1 }
 0x2a3   : > { %v6896_v62 = vpop.f32.mrb[93].mxu0  ;;  %v4218_v36 = vadd.f32 %v3062_v46, %v6761_v10  ;;  %v3064_v55 = vpop.f32.mrb[94].mxu1  ;;  %v4261_v46 = vadd.f32 %v6843_v56, %v6902_v51 }
 0x2a4   : > { %v6899_v52 = vpop.f32.mrb[94].mxu0  ;;  %3662 = vst [vmem:[%s6502_s4 + $0x430] sm:$0xff] %v4217_v8  ;;  %v4219_v27 = vadd.f32 %v3064_v55, %v6758_v37  ;;  %v3066_v22 = vpop.f32.mrb[95].mxu1 }
 0x2a5   : > { %v6906_v48 = vpop.f32.mrb[95].mxu0  ;;  %3663 = vst [vmem:[%s6502_s4 + $0x438] sm:$0xff] %v4218_v36  ;;  %v4220_v43 = vadd.f32 %v3066_v22, %v6761_v10  ;;  %v4263_v36 = vadd.f32 %v6846_v19, %v6909_v2  ;;  %v4265_v22 = vadd.f32 %v6849_v13, %v6902_v51 }
 0x2a6   : > { %3668 = vst [vmem:[%s6502_s4 + $0x460] sm:$0xff] %v4219_v27 }
 0x2a7   : > { %3669 = vst [vmem:[%s6502_s4 + $0x468] sm:$0xff] %v4220_v43 }
 0x2a9   : > { %v3469_v17 = vpop.f32.mrb[96].mxu1 }
 0x2aa   : > { %v3409_v37 = vpop.f32.mrb[48].mxu0  ;;  %v4246_v10 = vadd.f32 %v4245_v47, %v3469_v17  ;;  %v3471_v23 = vpop.f32.mrb[97].mxu1  ;;  %v4267_v17 = vadd.f32 %v6853_v35, %v6909_v2 }
 0x2ab   : > { %v4221_v25 = vadd.f32 %v3409_v37, %v6902_v51  ;;  %v3411_v38 = vpop.f32.mrb[49].mxu0  ;;  %v4248_v34 = vadd.f32 %v4247_v60, %v3471_v23  ;;  %v3473_v4 = vpop.f32.mrb[98].mxu1 }
 0x2ac   : > { %v4222_v41 = vadd.f32 %v3411_v38, %v6909_v2  ;;  %v3413_v33 = vpop.f32.mrb[50].mxu0  ;;  %3604 = vst [vmem:[%s6502_s4 + $0x260] sm:$0xff] %v4246_v10  ;;  %v4250_v53 = vadd.f32 %v4249_v49, %v3473_v4  ;;  %v3475_v61 = vpop.f32.mrb[99].mxu1 }
 0x2ad   : > { %3532 = vst [vmem:[%s6502_s4 + $0x20] sm:$0xff] %v4221_v25  ;;  %v4223_v31 = vadd.f32 %v3413_v33, %v6902_v51  ;;  %v3415_v59 = vpop.f32.mrb[51].mxu0  ;;  %3605 = vst [vmem:[%s6502_s4 + $0x268] sm:$0xff] %v4248_v34  ;;  %v4252_v21 = vadd.f32 %v4251_v40, %v3475_v61  ;;  %v4271_v34 = vadd.f32 %v6862_v6, %v6909_v2 }
 0x2ae   : > { %3533 = vst [vmem:[%s6502_s4 + $0x28] sm:$0xff] %v4222_v41  ;;  %v4224_v14 = vadd.f32 %v3415_v59, %v6909_v2  ;;  %3610 = vst [vmem:[%s6502_s4 + $0x290] sm:$0xff] %v4250_v53  ;;  %v4269_v41 = vadd.f32 %v6859_v1, %v6902_v51 }
 0x2af   : > { %3538 = vst [vmem:[%s6502_s4 + $0x50] sm:$0xff] %v4223_v31  ;;  %3611 = vst [vmem:[%s6502_s4 + $0x298] sm:$0xff] %v4252_v21  ;;  %v4273_v31 = vadd.f32 %v6865_v45, %v6902_v51  ;;  %v4275_v21 = vadd.f32 %v6869_v28, %v6909_v2 }
 0x2b0   : > { %3539 = vst [vmem:[%s6502_s4 + $0x58] sm:$0xff] %v4224_v14 }
 0x2b1   : > { %v3479_v12 = vpop.f32.mrb[100].mxu1 }
 0x2b2   : > { %v3419_v57 = vpop.f32.mrb[52].mxu0  ;;  %v4254_v5 = vadd.f32 %v4253_v11, %v3479_v12  ;;  %v3481_v9 = vpop.f32.mrb[101].mxu1 }
 0x2b3   : > { %v4225_v26 = vadd.f32 %v3419_v57, %v6902_v51  ;;  %v3421_v3 = vpop.f32.mrb[53].mxu0  ;;  %v4256_v63 = vadd.f32 %v4255_v18, %v3481_v9  ;;  %v3483_v24 = vpop.f32.mrb[102].mxu1 }
 0x2b4   : > { %v4226_v16 = vadd.f32 %v3421_v3, %v6909_v2  ;;  %v3423_v32 = vpop.f32.mrb[54].mxu0  ;;  %3616 = vst [vmem:[%s6502_s4 + $0x2c0] sm:$0xff] %v4254_v5  ;;  %v4258_v50 = vadd.f32 %v4257_v39, %v3483_v24  ;;  %v3485_v0 = vpop.f32.mrb[103].mxu1  ;;  %v4277_v5 = vadd.f32 %v6875_v20, %v6902_v51  ;;  %v4279_v3 = vadd.f32 %v6878_v7, %v6909_v2 }
 0x2b5   : > { %3544 = vst [vmem:[%s6502_s4 + $0x80] sm:$0xff] %v4225_v26  ;;  %v4227_v54 = vadd.f32 %v3423_v32, %v6902_v51  ;;  %v3425_v44 = vpop.f32.mrb[55].mxu0  ;;  %3617 = vst [vmem:[%s6502_s4 + $0x2c8] sm:$0xff] %v4256_v63  ;;  %v4260_v58 = vadd.f32 %v4259_v29, %v3485_v0 }
 0x2b6   : > { %3545 = vst [vmem:[%s6502_s4 + $0x88] sm:$0xff] %v4226_v16  ;;  %v4228_v8 = vadd.f32 %v3425_v44, %v6909_v2  ;;  %3622 = vst [vmem:[%s6502_s4 + $0x2f0] sm:$0xff] %v4258_v50  ;;  %v4281_v16 = vadd.f32 %v6881_v42, %v6902_v51  ;;  %v4283_v50 = vadd.f32 %v6885_v15, %v6909_v2 }
 0x2b7   : > { %3550 = vst [vmem:[%s6502_s4 + $0xb0] sm:$0xff] %v4227_v54  ;;  %3623 = vst [vmem:[%s6502_s4 + $0x2f8] sm:$0xff] %v4260_v58 }
 0x2b8   : > { %3551 = vst [vmem:[%s6502_s4 + $0xb8] sm:$0xff] %v4228_v8 }
 0x2b9   : > { %v3489_v27 = vpop.f32.mrb[104].mxu1 }
 0x2ba   : > { %v3429_v55 = vpop.f32.mrb[56].mxu0  ;;  %v4262_v47 = vadd.f32 %v4261_v46, %v3489_v27  ;;  %v3491_v37 = vpop.f32.mrb[105].mxu1  ;;  %v4287_v27 = vadd.f32 %v6896_v62, %v6909_v2 }
 0x2bb   : > { %v4229_v43 = vadd.f32 %v3429_v55, %v6902_v51  ;;  %v3431_v60 = vpop.f32.mrb[57].mxu0  ;;  %v4264_v19 = vadd.f32 %v4263_v36, %v3491_v37  ;;  %v3493_v25 = vpop.f32.mrb[106].mxu1  ;;  %v4285_v55 = vadd.f32 %v6893_v30, %v6902_v51  ;;  %v4291_v30 = vadd.f32 %v6906_v48, %v6909_v2 }
 0x2bc   : > { %v4230_v56 = vadd.f32 %v3431_v60, %v6909_v2  ;;  %v3433_v49 = vpop.f32.mrb[58].mxu0  ;;  %3628 = vst [vmem:[%s6502_s4 + $0x320] sm:$0xff] %v4262_v47  ;;  %v4266_v10 = vadd.f32 %v4265_v22, %v3493_v25  ;;  %v3495_v23 = vpop.f32.mrb[107].mxu1  ;;  %v4289_v47 = vadd.f32 %v6899_v52, %v6902_v51 }
 0x2bd   : > { %3556 = vst [vmem:[%s6502_s4 + $0xe0] sm:$0xff] %v4229_v43  ;;  %v4231_v13 = vadd.f32 %v3433_v49, %v6902_v51  ;;  %v3435_v38 = vpop.f32.mrb[59].mxu0  ;;  %3629 = vst [vmem:[%s6502_s4 + $0x328] sm:$0xff] %v4264_v19  ;;  %v4268_v35 = vadd.f32 %v4267_v17, %v3495_v23 }
 0x2be   : > { %3557 = vst [vmem:[%s6502_s4 + $0xe8] sm:$0xff] %v4230_v56  ;;  %v4232_v40 = vadd.f32 %v3435_v38, %v6909_v2  ;;  %3634 = vst [vmem:[%s6502_s4 + $0x350] sm:$0xff] %v4266_v10 }
 0x2bf   : > { %3562 = vst [vmem:[%s6502_s4 + $0x110] sm:$0xff] %v4231_v13  ;;  %3635 = vst [vmem:[%s6502_s4 + $0x358] sm:$0xff] %v4268_v35 }
 0x2c0   : > { %3563 = vst [vmem:[%s6502_s4 + $0x118] sm:$0xff] %v4232_v40 }
 0x2c1   : > { %v3499_v4 = vpop.f32.mrb[108].mxu1 }
 0x2c2   : > { %v3439_v33 = vpop.f32.mrb[60].mxu0  ;;  %v4270_v59 = vadd.f32 %v4269_v41, %v3499_v4  ;;  %v3501_v14 = vpop.f32.mrb[109].mxu1 }
 0x2c3   : > { %v4233_v53 = vadd.f32 %v3439_v33, %v6902_v51  ;;  %v3441_v61 = vpop.f32.mrb[61].mxu0  ;;  %v4272_v6 = vadd.f32 %v4271_v34, %v3501_v14  ;;  %v3503_v18 = vpop.f32.mrb[110].mxu1 }
 0x2c4   : > { %v4234_v1 = vadd.f32 %v3441_v61, %v6909_v2  ;;  %v3443_v11 = vpop.f32.mrb[62].mxu0  ;;  %3640 = vst [vmem:[%s6502_s4 + $0x380] sm:$0xff] %v4270_v59  ;;  %v4274_v57 = vadd.f32 %v4273_v31, %v3503_v18  ;;  %v3505_v39 = vpop.f32.mrb[111].mxu1 }
 0x2c5   : > { %3568 = vst [vmem:[%s6502_s4 + $0x140] sm:$0xff] %v4233_v53  ;;  %v4235_v45 = vadd.f32 %v3443_v11, %v6902_v51  ;;  %v3445_v12 = vpop.f32.mrb[63].mxu0  ;;  %3641 = vst [vmem:[%s6502_s4 + $0x388] sm:$0xff] %v4272_v6  ;;  %v4276_v28 = vadd.f32 %v4275_v21, %v3505_v39 }
 0x2c6   : > { %3569 = vst [vmem:[%s6502_s4 + $0x148] sm:$0xff] %v4234_v1  ;;  %v4236_v26 = vadd.f32 %v3445_v12, %v6909_v2  ;;  %3646 = vst [vmem:[%s6502_s4 + $0x3b0] sm:$0xff] %v4274_v57 }
 0x2c7   : > { %3574 = vst [vmem:[%s6502_s4 + $0x170] sm:$0xff] %v4235_v45  ;;  %3647 = vst [vmem:[%s6502_s4 + $0x3b8] sm:$0xff] %v4276_v28 }
 0x2c8   : > { %3575 = vst [vmem:[%s6502_s4 + $0x178] sm:$0xff] %v4236_v26 }
 0x2c9   : > { %v3509_v29 = vpop.f32.mrb[112].mxu1 }
 0x2ca   : > { %v3449_v9 = vpop.f32.mrb[64].mxu0  ;;  %v4278_v32 = vadd.f32 %v4277_v5, %v3509_v29  ;;  %v3511_v54 = vpop.f32.mrb[113].mxu1 }
 0x2cb   : > { %v4237_v63 = vadd.f32 %v3449_v9, %v6902_v51  ;;  %v3451_v24 = vpop.f32.mrb[65].mxu0  ;;  %v4280_v7 = vadd.f32 %v4279_v3, %v3511_v54  ;;  %v3513_v0 = vpop.f32.mrb[114].mxu1 }
 0x2cc   : > { %v4238_v20 = vadd.f32 %v3451_v24, %v6909_v2  ;;  %v3453_v44 = vpop.f32.mrb[66].mxu0  ;;  %3652 = vst [vmem:[%s6502_s4 + $0x3e0] sm:$0xff] %v4278_v32  ;;  %v4282_v8 = vadd.f32 %v4281_v16, %v3513_v0  ;;  %v3515_v46 = vpop.f32.mrb[115].mxu1 }
 0x2cd   : > { %3580 = vst [vmem:[%s6502_s4 + $0x1a0] sm:$0xff] %v4237_v63  ;;  %v4239_v42 = vadd.f32 %v3453_v44, %v6902_v51  ;;  %v3455_v58 = vpop.f32.mrb[67].mxu0  ;;  %3653 = vst [vmem:[%s6502_s4 + $0x3e8] sm:$0xff] %v4280_v7  ;;  %v4284_v36 = vadd.f32 %v4283_v50, %v3515_v46 }
 0x2ce   : > { %3581 = vst [vmem:[%s6502_s4 + $0x1a8] sm:$0xff] %v4238_v20  ;;  %v4240_v15 = vadd.f32 %v3455_v58, %v6909_v2  ;;  %3658 = vst [vmem:[%s6502_s4 + $0x410] sm:$0xff] %v4282_v8 }
 0x2cf   : > { %3586 = vst [vmem:[%s6502_s4 + $0x1d0] sm:$0xff] %v4239_v42  ;;  %3659 = vst [vmem:[%s6502_s4 + $0x418] sm:$0xff] %v4284_v36 }
 0x2d0   : > { %3587 = vst [vmem:[%s6502_s4 + $0x1d8] sm:$0xff] %v4240_v15 }
 0x2d1   : > { %v3519_v43 = vpop.f32.mrb[116].mxu1 }
 0x2d2   : > { %v3459_v22 = vpop.f32.mrb[68].mxu0  ;;  %v4286_v37 = vadd.f32 %v4285_v55, %v3519_v43  ;;  %v3521_v56 = vpop.f32.mrb[117].mxu1 }
 0x2d3   : > { %v4241_v60 = vadd.f32 %v3459_v22, %v6902_v51  ;;  %v3461_v17 = vpop.f32.mrb[69].mxu0  ;;  %v4288_v62 = vadd.f32 %v4287_v27, %v3521_v56  ;;  %v3523_v25 = vpop.f32.mrb[118].mxu1 }
 0x2d4   : > { %v4242_v19 = vadd.f32 %v3461_v17, %v6909_v2  ;;  %v3463_v49 = vpop.f32.mrb[70].mxu0  ;;  %3664 = vst [vmem:[%s6502_s4 + $0x440] sm:$0xff] %v4286_v37  ;;  %v4290_v13 = vadd.f32 %v4289_v47, %v3523_v25  ;;  %v3525_v38 = vpop.f32.mrb[119].mxu1 }
 0x2d5   : > { %3592 = vst [vmem:[%s6502_s4 + $0x200] sm:$0xff] %v4241_v60  ;;  %v4243_v52 = vadd.f32 %v3463_v49, %v6902_v51  ;;  %v3465_v10 = vpop.f32.mrb[71].mxu0  ;;  %3665 = vst [vmem:[%s6502_s4 + $0x448] sm:$0xff] %v4288_v62  ;;  %v4292_v23 = vadd.f32 %v4291_v30, %v3525_v38 }
 0x2d6   : > { %3593 = vst [vmem:[%s6502_s4 + $0x208] sm:$0xff] %v4242_v19  ;;  %v4244_v48 = vadd.f32 %v3465_v10, %v6909_v2  ;;  %3670 = vst [vmem:[%s6502_s4 + $0x470] sm:$0xff] %v4290_v13 }
 0x2d7   : > { %3598 = vst [vmem:[%s6502_s4 + $0x230] sm:$0xff] %v4243_v52  ;;  %3671 = vst [vmem:[%s6502_s4 + $0x478] sm:$0xff] %v4292_v23 }
 0x2d8   : > { %3599 = vst [vmem:[%s6502_s4 + $0x238] sm:$0xff] %v4244_v48 }
 0x2d9   : > { %4999 = shalt.err (!%p4996_p3)
}
 0x2da   : > { %s5000_s17 = scalar_lea.hbm %s7033_s20, 18432  ;;  %s5004_s5 = scalar_lea.hbm %s7090_s3, 36864 }
 0x2db   : > { %p5001_p4 = scmp.ne.s32.totalorder %s7033_s20, %s5000_s17  ;;  %p5005_p9 = scmp.lt.u32.totalorder %s7033_s20, %s7090_s3 }
 0x2dc   : > { %p5006_p10 = scmp.lt.u32.totalorder %s5004_s5, %s5000_s17  ;;  %p5008_p12 = scmp.lt.u32.totalorder %s5000_s17, %s7033_s20 }
 0x2dd   : > { %p5002_p7 = pnand %p5001_p4, %p5111_p5 }
 0x2de   : > { %p5007_p11 = por %p5006_p10, %p5005_p9 }
 0x2df   : > { %p5003_p8 = pneg %p5002_p7 }
 0x2e0   : > { %p5009_p13 = por %p5008_p12, %p5007_p11 }
 0x2e2   : > { %p5010_p0 = pnand %p5009_p13, %p5003_p8 }
 0x2e4   : > { %5013 = shalt.err (!%p5010_p0)
}
 0x2e5   : > { %s5051_s8 = smov 768   ;;  %s5052_s9 = smov 48  }
 0x2e6   : > { %4512 = dma.vmem_to_hbm [thread:$0]  (%p5111_p5), %s7035_s19, 18432, %s7033_s20, %s7046_s24, %s5051_s8, %s5051_s8, %s5052_s9  }
 0x2e7 PF: > { %p4519_p1 = scmp.ge.s32.totalorder %s5048_s15, 2  ;;  %s3702_s10 = sand.u32 1, %s5036_s12  }
 0x2e8   : > { %s3703_s11 = scalar_lea.sflag [#allocation3], %s3702_s10 }
 0x2e9   : > { %p4515_p2 = pnand %p4519_p1, %p5115_p6 }
 0x2eb   : > { %5031 = dma.done.wait (!%p4515_p2), %s3703_s11, 18432  }
 0x2ec   : > { %5033 = vsyncadd (!%p4515_p2), %s3703_s11, 4294948864  ;;  %p13_p3 = scmp.ge.s32.totalorder %s5098_s18, 4   ;;  %s7231_s12 = smov %s5040_s13 }
 0x2ed   : > { %s7232_s13 = smov %s5044_s14  ;;  %s7233_s14 = smov %s5109_s21 }
 0x2ee   : > { %s7234_s15 = smov %s5098_s18  ;;  %15 = sbr.rel (!%p13_p3) target bundleno = 3 (0x3), region = 67 }
 0x2f5   :  { %3708 = vsyncpa [#allocation3], 1 }
 0x2f6   :  { %3710 = vsyncpa [#allocation3 + $0x1], 1 }

</bundles_post_ra>
